<compile_context>
chip_gen: v6e
topology: v6e:2x2x1
jax: 0.10.0
libtpu: 0.0.40
codegen_flags: <defaults>
</compile_context>

<pallas_src>
import functools

import jax
import jax.numpy as jnp
from jax.experimental import pallas as pl
from jax.experimental.pallas import tpu as pltpu

HIDDEN = 256          # hidden width of each Q branch
WIDE = 2 * HIDDEN     # fused width of layer 1 (both branches)
OUT_ROWS = 8          # sublane-padded output rows; q1 -> row 0, q2 -> row 1
TB_UNIT = 256         # batch-tile granularity (lanes; MXU N granularity on v6e/v7x)


def _round_up(n, m):
    return ((n + m - 1) // m) * m


# ----------------------------------------------------------------------------
# Kernel: one batch tile (of lanes) per grid step; whole twin-Q forward fused.
# ----------------------------------------------------------------------------
def _critic_kernel(xa_ref, w1_ref, b1_ref, w25_ref, b25_ref,
                   w3h_ref, w3g_ref, b3_ref, out_ref, *, compute_dtype):
    # ---- Layer 1 (both branches fused): (512, TB) = (512, K) @ (K, TB)
    xa = xa_ref[...].astype(compute_dtype)
    h0 = jnp.dot(w1_ref[...], xa, preferred_element_type=jnp.float32) + b1_ref[...]
    h0 = jnp.maximum(h0, 0.0)

    # ---- Layer 2: per-branch (256,256) matmuls; bias + ReLU in f32,
    #      MXU operands in compute_dtype (bf16 by default, f32 on the exact path).
    b25 = b25_ref[...]
    h = h0[:HIDDEN].astype(compute_dtype)
    g = h0[HIDDEN:].astype(compute_dtype)
    h = jnp.maximum(
        jnp.dot(w25_ref[0], h, preferred_element_type=jnp.float32) + b25[0], 0.0)
    g = jnp.maximum(
        jnp.dot(w25_ref[1], g, preferred_element_type=jnp.float32) + b25[1], 0.0)

    # ---- Layer 3: compact (8, TB) lane-dense output; q1 in row 0, q2 in row 1
    #      (rows 2..7 are zero-weight padding for sublane alignment).
    out_ref[...] = (
        jnp.dot(w3h_ref[...], h.astype(compute_dtype), preferred_element_type=jnp.float32)
        + jnp.dot(w3g_ref[...], g.astype(compute_dtype), preferred_element_type=jnp.float32)
        + b3_ref[...])


# ----------------------------------------------------------------------------
# Parameter packing: per-layer (in, out) weights / (1, out) biases -> transposed
# (feature-major) fused layout consumed by the kernel. Done once, off the hot path.
# ----------------------------------------------------------------------------
def pack_critic_params(params, mm_dtype=jnp.bfloat16):
    # Layer 1 of both branches packed into one (512, K) transposed weight.
    w1T = jnp.concatenate([params["w1"], params["w4"]], axis=1).T.astype(mm_dtype)  # (512, K)
    b1T = jnp.concatenate([params["b1"], params["b4"]], axis=1).T                   # (512, 1) f32

    # Layer 2: stacked per-branch transposed 256x256 weights / column biases.
    w25T = jnp.stack([params["w2"].T, params["w5"].T], axis=0).astype(mm_dtype)     # (2,256,256)
    b25T = jnp.stack([params["b2"].T, params["b5"].T], axis=0)                      # (2,256,1) f32

    # Layer 3: q1 weight in row 0, q2 weight in row 1, rows 2..7 zero padding.
    w3hT = (jnp.zeros((OUT_ROWS, HIDDEN), jnp.float32)
            .at[0].set(params["w3"][:, 0]).astype(mm_dtype))
    w3gT = (jnp.zeros((OUT_ROWS, HIDDEN), jnp.float32)
            .at[1].set(params["w6"][:, 0]).astype(mm_dtype))
    b3T = (jnp.zeros((OUT_ROWS, 1), jnp.float32)
           .at[0, 0].set(params["b3"][0, 0])
           .at[1, 0].set(params["b6"][0, 0]))

    return {"w1T": w1T, "b1T": b1T, "w25T": w25T, "b25T": b25T,
            "w3hT": w3hT, "w3gT": w3gT, "b3T": b3T}


# ----------------------------------------------------------------------------
# Batch-tile selection: big tiles (amortize per-step overhead), multiple of 256,
# and >=2 grid steps when there is enough work so v7x megacore can shard the batch.
# ----------------------------------------------------------------------------
def _choose_batch_tile(B, tb_max):
    tb_max = max(TB_UNIT, (tb_max // TB_UNIT) * TB_UNIT)
    total = _round_up(B, TB_UNIT)
    tb = min(tb_max, total)
    if tb == total and total > TB_UNIT:
        tb = _round_up(total // 2, TB_UNIT)   # >=2 "parallel" steps (neutral on v5e/v6e)
    return tb


# ----------------------------------------------------------------------------
# Wrapper: batch-tiled pallas_call (batch on the lane axis).
# ----------------------------------------------------------------------------
def critic_forward(x, action, packed, *, tb_max=2048):
    """x: (B, S) f32, action: (B, A) f32, packed: output of pack_critic_params.
    Returns (q1, q2), each (B, 1) f32."""
    B = x.shape[0]
    K = x.shape[1] + action.shape[1]

    TB = _choose_batch_tile(B, tb_max)
    Bp = _round_up(B, TB)

    # Layout plumbing: build [x | action]^T once (batch -> lanes), zero-pad batch.
    xaT = jnp.concatenate([x.T, action.T], axis=0)        # (K, B) f32
    if Bp != B:
        xaT = jnp.pad(xaT, ((0, 0), (0, Bp - B)))

    compute_dtype = packed["w1T"].dtype
    kernel = functools.partial(_critic_kernel, compute_dtype=compute_dtype)

    out = pl.pallas_call(
        kernel,
        grid=(Bp // TB,),
        in_specs=[
            pl.BlockSpec((K, TB), lambda i: (0, i)),                 # [x|a]^T batch tile
            pl.BlockSpec((WIDE, K), lambda i: (0, 0)),               # W1|W4 (transposed)
            pl.BlockSpec((WIDE, 1), lambda i: (0, 0)),               # b1|b4
            pl.BlockSpec((2, HIDDEN, HIDDEN), lambda i: (0, 0, 0)),  # W2, W5 (transposed)
            pl.BlockSpec((2, HIDDEN, 1), lambda i: (0, 0, 0)),       # b2, b5
            pl.BlockSpec((OUT_ROWS, HIDDEN), lambda i: (0, 0)),      # W3 in row 0 (padded)
            pl.BlockSpec((OUT_ROWS, HIDDEN), lambda i: (0, 0)),      # W6 in row 1 (padded)
            pl.BlockSpec((OUT_ROWS, 1), lambda i: (0, 0)),           # b3/b6 (padded)
        ],
        out_specs=pl.BlockSpec((OUT_ROWS, TB), lambda i: (0, i)),
        out_shape=jax.ShapeDtypeStruct((OUT_ROWS, Bp), jnp.float32),
        compiler_params=pltpu.CompilerParams(
            dimension_semantics=("parallel",),       # batch tiles shard across TCs (v7x)
            vmem_limit_bytes=32 * 1024 * 1024,       # sized against v7x's 64 MiB VMEM
        ),
    )(xaT, packed["w1T"], packed["b1T"], packed["w25T"], packed["b25T"],
      packed["w3hT"], packed["w3gT"], packed["b3T"])

    # Layout plumbing only: row 0 = q1, row 1 = q2.
    q1 = out[0, :B].reshape(B, 1)
    q2 = out[1, :B].reshape(B, 1)
    return q1, q2


# ----------------------------------------------------------------------------
# Init + pure-JAX reference
# ----------------------------------------------------------------------------
def init_critic_params(key, state_dim, action_dim):
    """nn.Linear-style init; weights stored (in, out), biases (1, out)."""
    in_dim = state_dim + action_dim
    dims = [(in_dim, HIDDEN), (HIDDEN, HIDDEN), (HIDDEN, 1),
            (in_dim, HIDDEN), (HIDDEN, HIDDEN), (HIDDEN, 1)]
    params = {}
    keys = jax.random.split(key, 12)
    for idx, (fan_in, fan_out) in enumerate(dims):
        bound = 1.0 / jnp.sqrt(fan_in)
        params[f"w{idx + 1}"] = jax.random.uniform(
            keys[2 * idx], (fan_in, fan_out), minval=-bound, maxval=bound,
            dtype=jnp.float32)
        params[f"b{idx + 1}"] = jax.random.uniform(
            keys[2 * idx + 1], (1, fan_out), minval=-bound, maxval=bound,
            dtype=jnp.float32)
    return params


def critic_forward_ref(x, action, params):
    xa = jnp.concatenate([x, action], axis=1)
    h = jax.nn.relu(xa @ params["w1"] + params["b1"])
    h = jax.nn.relu(h @ params["w2"] + params["b2"])
    q1 = h @ params["w3"] + params["b3"]
    g = jax.nn.relu(xa @ params["w4"] + params["b4"])
    g = jax.nn.relu(g @ params["w5"] + params["b5"])
    q2 = g @ params["w6"] + params["b6"]
    return q1, q2


if __name__ == "__main__":
    STATE_DIM, ACTION_DIM, BATCH = 12, 4, 8

    key = jax.random.PRNGKey(0)
    k_params, k_x, k_a = jax.random.split(key, 3)

    params = init_critic_params(k_params, STATE_DIM, ACTION_DIM)
    x = jax.random.normal(k_x, (BATCH, STATE_DIM), dtype=jnp.float32)
    action = jax.random.normal(k_a, (BATCH, ACTION_DIM), dtype=jnp.float32)

    q1_ref, q2_ref = critic_forward_ref(x, action, params)

    # ---- exact f32 MXU path -------------------------------------------------
    packed_f32 = pack_critic_params(params, jnp.float32)
    q1, q2 = critic_forward(x, action, packed_f32)
    q1 = jax.block_until_ready(q1)
    q2 = jax.block_until_ready(q2)
    assert q1.shape == (BATCH, 1) and q2.shape == (BATCH, 1)
    assert jnp.allclose(q1, q1_ref, atol=2e-5, rtol=2e-5)
    assert jnp.allclose(q2, q2_ref, atol=2e-5, rtol=2e-5)

    # ---- default bf16 MXU operands (f32 accumulation), looser tolerance -----
    packed_bf16 = pack_critic_params(params)   # bf16 is the default pack
    q1b, q2b = critic_forward(x, action, packed_bf16)
    q1b = jax.block_until_ready(q1b)
    q2b = jax.block_until_ready(q2b)
    assert jnp.allclose(q1b, q1_ref, atol=5e-2, rtol=5e-2)
    assert jnp.allclose(q2b, q2_ref, atol=5e-2, rtol=5e-2)

    # ---- batch-tiled path: padding + >=2 "parallel" grid steps --------------
    BIG = 300   # -> TB = 256, Bp = 512, grid = (2,)
    kx2, ka2 = jax.random.split(jax.random.PRNGKey(1))
    xb = jax.random.normal(kx2, (BIG, STATE_DIM), dtype=jnp.float32)
    ab = jax.random.normal(ka2, (BIG, ACTION_DIM), dtype=jnp.float32)
    q1t, q2t = critic_forward(xb, ab, packed_f32)
    q1t = jax.block_until_ready(q1t)
    q2t = jax.block_until_ready(q2t)
    q1t_ref, q2t_ref = critic_forward_ref(xb, ab, params)
    assert q1t.shape == (BIG, 1) and q2t.shape == (BIG, 1)
    assert jnp.allclose(q1t, q1t_ref, atol=2e-5, rtol=2e-5)
    assert jnp.allclose(q2t, q2t_ref, atol=2e-5, rtol=2e-5)

    print("KERNEL_OK")
</pallas_src>

<mosaic_0001>
module attributes {stable_mosaic.version = 11 : i64} {
  func.func @_critic_kernel(%arg0: i32, %arg1: memref<16x256xf32, #tpu.memory_space<vmem>>, %arg2: memref<512x16xf32, #tpu.memory_space<vmem>>, %arg3: memref<512x1xf32, #tpu.memory_space<vmem>>, %arg4: memref<2x256x256xf32, #tpu.memory_space<vmem>>, %arg5: memref<2x256x1xf32, #tpu.memory_space<vmem>>, %arg6: memref<8x256xf32, #tpu.memory_space<vmem>>, %arg7: memref<8x256xf32, #tpu.memory_space<vmem>>, %arg8: memref<8x1xf32, #tpu.memory_space<vmem>>, %arg9: memref<8x256xf32, #tpu.memory_space<vmem>>) attributes {dimension_semantics = [#tpu.dimension_semantics<parallel>], iteration_bounds = array<i64: 1>, scalar_prefetch = 0 : i64, scratch_operands = 0 : i64, tpu.core_type = #tpu.core_type<tc>, window_params = [{transform_indices = @transform_0, window_bounds = array<i64: 16, 256>}, {pipeline_mode = #tpu.pipeline_mode<synchronous>, transform_indices = @transform_1, window_bounds = array<i64: 512, 16>}, {pipeline_mode = #tpu.pipeline_mode<synchronous>, transform_indices = @transform_2, window_bounds = array<i64: 512, 1>}, {pipeline_mode = #tpu.pipeline_mode<synchronous>, transform_indices = @transform_3, window_bounds = array<i64: 2, 256, 256>}, {pipeline_mode = #tpu.pipeline_mode<synchronous>, transform_indices = @transform_4, window_bounds = array<i64: 2, 256, 1>}, {pipeline_mode = #tpu.pipeline_mode<synchronous>, transform_indices = @transform_5, window_bounds = array<i64: 8, 256>}, {pipeline_mode = #tpu.pipeline_mode<synchronous>, transform_indices = @transform_6, window_bounds = array<i64: 8, 256>}, {pipeline_mode = #tpu.pipeline_mode<synchronous>, transform_indices = @transform_7, window_bounds = array<i64: 8, 1>}, {transform_indices = @transform_8, window_bounds = array<i64: 8, 256>}]} {
    %c0 = arith.constant 0 : index
    %c0_0 = arith.constant 0 : index
    %0 = vector.load %arg1[%c0, %c0_0] : memref<16x256xf32, #tpu.memory_space<vmem>>, vector<16x256xf32>
    %c0_1 = arith.constant 0 : index
    %c0_2 = arith.constant 0 : index
    %1 = vector.load %arg2[%c0_1, %c0_2] : memref<512x16xf32, #tpu.memory_space<vmem>>, vector<512x16xf32>
    %cst = arith.constant dense<0.000000e+00> : vector<512x256xf32>
    %2 = tpu.matmul %1, %0, %cst {dimension_numbers = #tpu.dot_dimension_numbers<[1], [0], [0], [1], [0, 0, 1, 1], [], []>} : vector<512x16xf32>, vector<16x256xf32>, vector<512x256xf32> -> vector<512x256xf32>
    %c0_3 = arith.constant 0 : index
    %c0_4 = arith.constant 0 : index
    %3 = vector.load %arg3[%c0_3, %c0_4] : memref<512x1xf32, #tpu.memory_space<vmem>>, vector<512x1xf32>
    %4 = vector.broadcast %3 : vector<512x1xf32> to vector<512x256xf32>
    %5 = arith.addf %2, %4 : vector<512x256xf32>
    %cst_5 = arith.constant 0.000000e+00 : f32
    %6 = vector.broadcast %cst_5 : f32 to vector<512x256xf32>
    %7 = arith.maximumf %5, %6 : vector<512x256xf32>
    %c0_6 = arith.constant 0 : index
    %c0_7 = arith.constant 0 : index
    %c0_8 = arith.constant 0 : index
    %8 = vector.load %arg5[%c0_6, %c0_7, %c0_8] : memref<2x256x1xf32, #tpu.memory_space<vmem>>, vector<2x256x1xf32>
    %9 = vector.extract_strided_slice %7 {offsets = [0, 0], sizes = [256, 256], strides = [1, 1]} : vector<512x256xf32> to vector<256x256xf32>
    %10 = vector.extract_strided_slice %7 {offsets = [256, 0], sizes = [256, 256], strides = [1, 1]} : vector<512x256xf32> to vector<256x256xf32>
    %c0_9 = arith.constant 0 : index
    %c0_10 = arith.constant 0 : index
    %c0_11 = arith.constant 0 : index
    %11 = vector.load %arg4[%c0_9, %c0_10, %c0_11] : memref<2x256x256xf32, #tpu.memory_space<vmem>>, vector<1x256x256xf32>
    %12 = vector.shape_cast %11 : vector<1x256x256xf32> to vector<256x256xf32>
    %cst_12 = arith.constant dense<0.000000e+00> : vector<256x256xf32>
    %13 = tpu.matmul %12, %9, %cst_12 {dimension_numbers = #tpu.dot_dimension_numbers<[1], [0], [0], [1], [0, 0, 1, 1], [], []>} : vector<256x256xf32>, vector<256x256xf32>, vector<256x256xf32> -> vector<256x256xf32>
    %14 = vector.extract_strided_slice %8 {offsets = [0, 0, 0], sizes = [1, 256, 1], strides = [1, 1, 1]} : vector<2x256x1xf32> to vector<1x256x1xf32>
    %15 = vector.shape_cast %14 : vector<1x256x1xf32> to vector<256x1xf32>
    %16 = vector.broadcast %15 : vector<256x1xf32> to vector<256x256xf32>
    %17 = arith.addf %13, %16 : vector<256x256xf32>
    %cst_13 = arith.constant 0.000000e+00 : f32
    %18 = vector.broadcast %cst_13 : f32 to vector<256x256xf32>
    %19 = arith.maximumf %17, %18 : vector<256x256xf32>
    %c1 = arith.constant 1 : index
    %c0_14 = arith.constant 0 : index
    %c0_15 = arith.constant 0 : index
    %20 = vector.load %arg4[%c1, %c0_14, %c0_15] : memref<2x256x256xf32, #tpu.memory_space<vmem>>, vector<1x256x256xf32>
    %21 = vector.shape_cast %20 : vector<1x256x256xf32> to vector<256x256xf32>
    %cst_16 = arith.constant dense<0.000000e+00> : vector<256x256xf32>
    %22 = tpu.matmul %21, %10, %cst_16 {dimension_numbers = #tpu.dot_dimension_numbers<[1], [0], [0], [1], [0, 0, 1, 1], [], []>} : vector<256x256xf32>, vector<256x256xf32>, vector<256x256xf32> -> vector<256x256xf32>
    %23 = vector.extract_strided_slice %8 {offsets = [1, 0, 0], sizes = [1, 256, 1], strides = [1, 1, 1]} : vector<2x256x1xf32> to vector<1x256x1xf32>
    %24 = vector.shape_cast %23 : vector<1x256x1xf32> to vector<256x1xf32>
    %25 = vector.broadcast %24 : vector<256x1xf32> to vector<256x256xf32>
    %26 = arith.addf %22, %25 : vector<256x256xf32>
    %cst_17 = arith.constant 0.000000e+00 : f32
    %27 = vector.broadcast %cst_17 : f32 to vector<256x256xf32>
    %28 = arith.maximumf %26, %27 : vector<256x256xf32>
    %c0_18 = arith.constant 0 : index
    %c0_19 = arith.constant 0 : index
    %29 = vector.load %arg6[%c0_18, %c0_19] : memref<8x256xf32, #tpu.memory_space<vmem>>, vector<8x256xf32>
    %cst_20 = arith.constant dense<0.000000e+00> : vector<8x256xf32>
    %30 = tpu.matmul %29, %19, %cst_20 {dimension_numbers = #tpu.dot_dimension_numbers<[1], [0], [0], [1], [0, 0, 1, 1], [], []>} : vector<8x256xf32>, vector<256x256xf32>, vector<8x256xf32> -> vector<8x256xf32>
    %c0_21 = arith.constant 0 : index
    %c0_22 = arith.constant 0 : index
    %31 = vector.load %arg7[%c0_21, %c0_22] : memref<8x256xf32, #tpu.memory_space<vmem>>, vector<8x256xf32>
    %cst_23 = arith.constant dense<0.000000e+00> : vector<8x256xf32>
    %32 = tpu.matmul %31, %28, %cst_23 {dimension_numbers = #tpu.dot_dimension_numbers<[1], [0], [0], [1], [0, 0, 1, 1], [], []>} : vector<8x256xf32>, vector<256x256xf32>, vector<8x256xf32> -> vector<8x256xf32>
    %33 = arith.addf %30, %32 : vector<8x256xf32>
    %c0_24 = arith.constant 0 : index
    %c0_25 = arith.constant 0 : index
    %34 = vector.load %arg8[%c0_24, %c0_25] : memref<8x1xf32, #tpu.memory_space<vmem>>, vector<8x1xf32>
    %35 = vector.broadcast %34 : vector<8x1xf32> to vector<8x256xf32>
    %36 = arith.addf %33, %35 : vector<8x256xf32>
    %c0_26 = arith.constant 0 : index
    %c0_27 = arith.constant 0 : index
    %37 = vector.load %arg9[%c0_26, %c0_27] : memref<8x256xf32, #tpu.memory_space<vmem>>, vector<8x256xf32>
    tpu.vector_store %arg9[%c0_26, %c0_27], %36 {strides = array<i32>} : memref<8x256xf32, #tpu.memory_space<vmem>>, vector<8x256xf32>,
    return
  }
  func.func @transform_0(%arg0: i32) -> (i32, i32) {
    %c0_i32 = arith.constant 0 : i32
    %c0_i32_0 = arith.constant 0 : i32
    return %c0_i32, %arg0 : i32, i32
  }
  func.func @transform_1(%arg0: i32) -> (i32, i32) {
    %c0_i32 = arith.constant 0 : i32
    %c0_i32_0 = arith.constant 0 : i32
    %c0_i32_1 = arith.constant 0 : i32
    return %c0_i32, %c0_i32_0 : i32, i32
  }
  func.func @transform_2(%arg0: i32) -> (i32, i32) {
    %c0_i32 = arith.constant 0 : i32
    %c0_i32_0 = arith.constant 0 : i32
    %c0_i32_1 = arith.constant 0 : i32
    return %c0_i32, %c0_i32_0 : i32, i32
  }
  func.func @transform_3(%arg0: i32) -> (i32, i32, i32) {
    %c0_i32 = arith.constant 0 : i32
    %c0_i32_0 = arith.constant 0 : i32
    %c0_i32_1 = arith.constant 0 : i32
    %c0_i32_2 = arith.constant 0 : i32
    return %c0_i32, %c0_i32_0, %c0_i32_1 : i32, i32, i32
  }
  func.func @transform_4(%arg0: i32) -> (i32, i32, i32) {
    %c0_i32 = arith.constant 0 : i32
    %c0_i32_0 = arith.constant 0 : i32
    %c0_i32_1 = arith.constant 0 : i32
    %c0_i32_2 = arith.constant 0 : i32
    return %c0_i32, %c0_i32_0, %c0_i32_1 : i32, i32, i32
  }
  func.func @transform_5(%arg0: i32) -> (i32, i32) {
    %c0_i32 = arith.constant 0 : i32
    %c0_i32_0 = arith.constant 0 : i32
    %c0_i32_1 = arith.constant 0 : i32
    return %c0_i32, %c0_i32_0 : i32, i32
  }
  func.func @transform_6(%arg0: i32) -> (i32, i32) {
    %c0_i32 = arith.constant 0 : i32
    %c0_i32_0 = arith.constant 0 : i32
    %c0_i32_1 = arith.constant 0 : i32
    return %c0_i32, %c0_i32_0 : i32, i32
  }
  func.func @transform_7(%arg0: i32) -> (i32, i32) {
    %c0_i32 = arith.constant 0 : i32
    %c0_i32_0 = arith.constant 0 : i32
    %c0_i32_1 = arith.constant 0 : i32
    return %c0_i32, %c0_i32_0 : i32, i32
  }
  func.func @transform_8(%arg0: i32) -> (i32, i32) {
    %c0_i32 = arith.constant 0 : i32
    %c0_i32_0 = arith.constant 0 : i32
    return %c0_i32, %arg0 : i32, i32
  }
}

</mosaic_0001>

<bundles_post_ra>
// kernel: tpu_custom_call.1
= control target key start
LH: loop header
LB: loop body
LE: loop exit
PB: predicated region body
PF: predicated region fallthrough
CT: control target
= control target key end

     0   :  { %v2732_v3 = vmov 0   ;;  %vm482_vm0 = vcmask 130048   ;;  %v2733_v9 = vmov 0.0   ;;  %s4685_s0 = inlined_call_operand.vmem [shape: f32[16,256], index: 0, kind: input, shape index: {}]   ;;  %s4686_s1 = inlined_call_operand.vmem [shape: f32[512,16], index: 1, kind: input, shape index: {}]   ;;  %s4687_s2 = inlined_call_operand.vmem [shape: f32[512,1], index: 2, kind: input, shape index: {}]   ;;  %s4688_s3 = inlined_call_operand.vmem [shape: f32[2,256,256], index: 3, kind: input, shape index: {}]   ;;  %s4689_s4 = inlined_call_operand.vmem [shape: f32[2,256,1], index: 4, kind: input, shape index: {}]   ;;  %s4690_s5 = inlined_call_operand.vmem [shape: f32[8,256], index: 5, kind: input, shape index: {}]   ;;  %s4691_s6 = inlined_call_operand.vmem [shape: f32[8,256], index: 6, kind: input, shape index: {}]   ;;  %s4692_s7 = inlined_call_operand.vmem [shape: f32[8,1], index: 7, kind: input, shape index: {}]   ;;  %s4693_s8 = inlined_call_operand.hbm [shape: f32[8,256], index: 8, kind: output, shape index: {}]  }
   0x1   :  { %v33_v0 = vld [vmem:[%s4685_s0 + $0x18] sm:$0xff]  ;;  %v111_v2 = vld [vmem:[%s4687_s2 + $0x68] sm:$0xff]  ;;  %2709 = vset.pattern.permute.xlu1 %v2732_v3  ;;  %2708 = vset.pattern.permute.xlu0 %v2732_v3  ;;  %v32_v4 = vld [vmem:[%s4685_s0 + $0x10] sm:$0xff] }
   0x2   :  { %v113_v1 = vld [vmem:[%s4687_s2 + $0x78] sm:$0xff]  ;;  %v31_v5 = vld [vmem:[%s4685_s0 + $0x8] sm:$0xff]  ;;  %703 = vmatprep.subr.mxu0 %v33_v0  ;;  %v30_v6 = vld [vmem:[%s4685_s0] sm:$0xff]  ;;  %229 = vperm.xlu1 %2709, %v111_v2  }
   0x3   :  { %239 = vperm.xlu0 %2708, %v113_v1   ;;  %704 = vmatpush1.msra.mxu0 %v32_v4  ;;  %v34_v7 = vld [vmem:[%s4686_s1] sm:$0xff]  ;;  %v112_v8 = vld [vmem:[%s4687_s2 + $0x70] sm:$0xff]  ;;  %v35_v11 = vld [vmem:[%s4686_s1 + $0x8] sm:$0xff] }
   0x4   :  { %705 = vmatprep.subr.mxu0 %v31_v5  ;;  %739 = vmatprep.mubr.f32.mxu0 %v2733_v9  ;;  %v110_v10 = vld [vmem:[%s4687_s2 + $0x60] sm:$0xff]  ;;  %v109_v12 = vld [vmem:[%s4687_s2 + $0x58] sm:$0xff]  ;;  %v108_v13 = vld [vmem:[%s4687_s2 + $0x50] sm:$0xff] }
   0x5   :  { %706 = vmatpush1.msra.mxu0 %v30_v6  ;;  %v36_v14 = vld [vmem:[%s4686_s1 + $0x10] sm:$0xff]  ;;  %v107_v15 = vld [vmem:[%s4687_s2 + $0x48] sm:$0xff]  ;;  %v106_v16 = vld [vmem:[%s4687_s2 + $0x40] sm:$0xff] }
   0x6   :  { %2577 = vmatmul.mubr.msk.f32.vlgmr.msra.gmra.mxu0 %vm482_vm0, %v34_v7  ;;  %224 = vperm.xlu1 %2709, %v110_v10   ;;  %v37_v17 = vld [vmem:[%s4686_s1 + $0x18] sm:$0xff]  ;;  %v104_v19 = vld [vmem:[%s4687_s2 + $0x30] sm:$0xff]  ;;  %v38_v20 = vld [vmem:[%s4686_s1 + $0x20] sm:$0xff] }
   0x7   :  { %234 = vperm.xlu0 %2708, %v112_v8   ;;  %745 = vmatprep.mubr.f32.mxu0 %v2733_v9  ;;  %v105_v18 = vld [vmem:[%s4687_s2 + $0x38] sm:$0xff]  ;;  %v103_v21 = vld [vmem:[%s4687_s2 + $0x28] sm:$0xff]  ;;  %v102_v22 = vld [vmem:[%s4687_s2 + $0x20] sm:$0xff] }
   0x8   :  { %v39_v23 = vld [vmem:[%s4686_s1 + $0x28] sm:$0xff]  ;;  %v101_v24 = vld [vmem:[%s4687_s2 + $0x18] sm:$0xff]  ;;  %v100_v25 = vld [vmem:[%s4687_s2 + $0x10] sm:$0xff] }
   0x9   :  { %v40_v26 = vld [vmem:[%s4686_s1 + $0x30] sm:$0xff]  ;;  %v99_v27 = vld [vmem:[%s4687_s2 + $0x8] sm:$0xff]  ;;  %v98_v28 = vld [vmem:[%s4687_s2] sm:$0xff] }
   0xa   :  { %2578 = vmatmul.mubr.msk.f32.gmra.mxu0 %vm482_vm0, %v35_v11  ;;  %214 = vperm.xlu1 %2709, %v108_v13   ;;  %v41_v29 = vld [vmem:[%s4686_s1 + $0x38] sm:$0xff]  ;;  %v128_v31 = vld [vmem:[%s4687_s2 + $0xf0] sm:$0xff]  ;;  %v42_v32 = vld [vmem:[%s4686_s1 + $0x40] sm:$0xff] }
   0xb   :  { %219 = vperm.xlu0 %2708, %v109_v12   ;;  %751 = vmatprep.mubr.f32.mxu0 %v2733_v9  ;;  %v129_v30 = vld [vmem:[%s4687_s2 + $0xf8] sm:$0xff]  ;;  %v127_v33 = vld [vmem:[%s4687_s2 + $0xe8] sm:$0xff]  ;;  %v126_v34 = vld [vmem:[%s4687_s2 + $0xe0] sm:$0xff] }
   0xc   :  { %v43_v35 = vld [vmem:[%s4686_s1 + $0x48] sm:$0xff]  ;;  %v125_v36 = vld [vmem:[%s4687_s2 + $0xd8] sm:$0xff]  ;;  %v124_v37 = vld [vmem:[%s4687_s2 + $0xd0] sm:$0xff] }
   0xd   :  { %v44_v38 = vld [vmem:[%s4686_s1 + $0x50] sm:$0xff]  ;;  %v123_v39 = vld [vmem:[%s4687_s2 + $0xc8] sm:$0xff]  ;;  %v122_v40 = vld [vmem:[%s4687_s2 + $0xc0] sm:$0xff] }
   0xe   :  { %2579 = vmatmul.mubr.msk.f32.gmra.mxu0 %vm482_vm0, %v36_v14  ;;  %204 = vperm.xlu1 %2709, %v106_v16  }
   0xf   :  { %209 = vperm.xlu0 %2708, %v107_v15   ;;  %757 = vmatprep.mubr.f32.mxu0 %v2733_v9 }
  0x12   :  { %2580 = vmatmul.mubr.msk.f32.gmra.mxu0 %vm482_vm0, %v37_v17  ;;  %194 = vperm.xlu1 %2709, %v104_v19  }
  0x13   :  { %199 = vperm.xlu0 %2708, %v105_v18   ;;  %763 = vmatprep.mubr.f32.mxu0 %v2733_v9 }
  0x16   :  { %2581 = vmatmul.mubr.msk.f32.gmra.mxu0 %vm482_vm0, %v38_v20  ;;  %184 = vperm.xlu1 %2709, %v102_v22  }
  0x17   :  { %189 = vperm.xlu0 %2708, %v103_v21   ;;  %769 = vmatprep.mubr.f32.mxu0 %v2733_v9 }
  0x1a   :  { %2582 = vmatmul.mubr.msk.f32.gmra.mxu0 %vm482_vm0, %v39_v23  ;;  %174 = vperm.xlu1 %2709, %v100_v25  }
  0x1b   :  { %179 = vperm.xlu0 %2708, %v101_v24   ;;  %775 = vmatprep.mubr.f32.mxu0 %v2733_v9 }
  0x1e   :  { %2583 = vmatmul.mubr.msk.f32.gmra.mxu0 %vm482_vm0, %v40_v26  ;;  %164 = vperm.xlu1 %2709, %v98_v28  }
  0x1f   :  { %169 = vperm.xlu0 %2708, %v99_v27   ;;  %781 = vmatprep.mubr.f32.mxu0 %v2733_v9 }
  0x22   :  { %2584 = vmatmul.mubr.msk.f32.gmra.mxu0 %vm482_vm0, %v41_v29  ;;  %314 = vperm.xlu1 %2709, %v128_v31  }
  0x23   :  { %319 = vperm.xlu0 %2708, %v129_v30   ;;  %787 = vmatprep.mubr.f32.mxu0 %v2733_v9 }
  0x26   :  { %2585 = vmatmul.mubr.msk.f32.gmra.mxu0 %vm482_vm0, %v42_v32  ;;  %304 = vperm.xlu1 %2709, %v126_v34  }
  0x27   :  { %309 = vperm.xlu0 %2708, %v127_v33   ;;  %793 = vmatprep.mubr.f32.mxu0 %v2733_v9 }
  0x2a   :  { %2586 = vmatmul.mubr.msk.f32.gmra.mxu0 %vm482_vm0, %v43_v35  ;;  %294 = vperm.xlu1 %2709, %v124_v37  }
  0x2b   :  { %299 = vperm.xlu0 %2708, %v125_v36   ;;  %799 = vmatprep.mubr.f32.mxu0 %v2733_v9 }
  0x2c   :  { %13 = vsyncpa [#allocation3], 0  ;;  %v45_v41 = vld [vmem:[%s4686_s1 + $0x58] sm:$0xff]  ;;  %v120_v43 = vld [vmem:[%s4687_s2 + $0xb0] sm:$0xff]  ;;  %s2734_s15 = smov [#allocation2]  }
  0x2d   :  { %v121_v42 = vld [vmem:[%s4687_s2 + $0xb8] sm:$0xff]  ;;  %v46_v44 = vld [vmem:[%s4686_s1 + $0x60] sm:$0xff]  ;;  %v119_v45 = vld [vmem:[%s4687_s2 + $0xa8] sm:$0xff]  ;;  %s2569_s16 = sshll.u32 %s2734_s15, 4  ;;  %s2570_s16 = int_to_ptr.vmem [resolvable:$true] %s2569_s16 }
  0x2e   :  { %2587 = vmatmul.mubr.msk.f32.gmra.mxu0 %vm482_vm0, %v44_v38  ;;  %284 = vperm.xlu1 %2709, %v122_v40   ;;  %v118_v46 = vld [vmem:[%s4687_s2 + $0xa0] sm:$0xff]  ;;  %v47_v47 = vld [vmem:[%s4686_s1 + $0x68] sm:$0xff]  ;;  %v117_v48 = vld [vmem:[%s4687_s2 + $0x98] sm:$0xff]  ;;  %s2710_s17 = scalar_lea.vmem %s2570_s16, 256  ;;  %p2715_p1 = scmp.lt.s32.totalorder %s2570_s16, %s2570_s16 }
  0x2f   :  { %289 = vperm.xlu0 %2708, %v123_v39   ;;  %805 = vmatprep.mubr.f32.mxu0 %v2733_v9  ;;  %v116_v49 = vld [vmem:[%s4687_s2 + $0x90] sm:$0xff]  ;;  %v115_v51 = vld [vmem:[%s4687_s2 + $0x88] sm:$0xff]  ;;  %v114_v52 = vld [vmem:[%s4687_s2 + $0x80] sm:$0xff]  ;;  %p2711_p0 = scmp.ne.s32.totalorder %s2570_s16, %s2710_s17  ;;  %p2716_p2 = scmp.lt.s32.totalorder %s2710_s17, %s2710_s17 }
  0x30   :  { %v48_v50 = vld [vmem:[%s4686_s1 + $0x70] sm:$0xff]  ;;  %v49_v53 = vld [vmem:[%s4686_s1 + $0x78] sm:$0xff]  ;;  %v50_v56 = vld [vmem:[%s4686_s1 + $0x80] sm:$0xff] }
  0x31   :  { %v145_v54 = vld [vmem:[%s4687_s2 + $0x178] sm:$0xff]  ;;  %v144_v55 = vld [vmem:[%s4687_s2 + $0x170] sm:$0xff]  ;;  %v143_v57 = vld [vmem:[%s4687_s2 + $0x168] sm:$0xff]  ;;  %p2717_p3 = por %p2716_p2, %p2715_p1 }
  0x32   :  { %2588 = vmatmul.mubr.msk.f32.gmra.mxu0 %vm482_vm0, %v45_v41  ;;  %274 = vperm.xlu1 %2709, %v120_v43   ;;  %v142_v58 = vld [vmem:[%s4687_s2 + $0x160] sm:$0xff]  ;;  %v51_v59 = vld [vmem:[%s4686_s1 + $0x88] sm:$0xff]  ;;  %v141_v60 = vld [vmem:[%s4687_s2 + $0x158] sm:$0xff] }
  0x33   :  { %279 = vperm.xlu0 %2708, %v121_v42   ;;  %811 = vmatprep.mubr.f32.mxu0 %v2733_v9  ;;  %v140_v61 = vld [vmem:[%s4687_s2 + $0x150] sm:$0xff]  ;;  %v139_v63 = vld [vmem:[%s4687_s2 + $0x148] sm:$0xff]  ;;  %v138_v0 = vld [vmem:[%s4687_s2 + $0x140] sm:$0xff]  ;;  %p2718_p4 = pnand %p2717_p3, %p2711_p0 }
  0x34   :  { %v52_v62 = vld [vmem:[%s4686_s1 + $0x90] sm:$0xff]  ;;  %v53_v1 = vld [vmem:[%s4686_s1 + $0x98] sm:$0xff]  ;;  %v54_v4 = vld [vmem:[%s4686_s1 + $0xa0] sm:$0xff] }
  0x35   :  { %v137_v2 = vld [vmem:[%s4687_s2 + $0x138] sm:$0xff]  ;;  %v136_v3 = vld [vmem:[%s4687_s2 + $0x130] sm:$0xff]  ;;  %v135_v5 = vld [vmem:[%s4687_s2 + $0x128] sm:$0xff] }
  0x36   :  { %2589 = vmatmul.mubr.msk.f32.gmra.mxu0 %vm482_vm0, %v46_v44  ;;  %264 = vperm.xlu1 %2709, %v118_v46   ;;  %v134_v6 = vld [vmem:[%s4687_s2 + $0x120] sm:$0xff]  ;;  %v55_v7 = vld [vmem:[%s4686_s1 + $0xa8] sm:$0xff]  ;;  %v133_v8 = vld [vmem:[%s4687_s2 + $0x118] sm:$0xff] }
  0x37   :  { %269 = vperm.xlu0 %2708, %v119_v45   ;;  %817 = vmatprep.mubr.f32.mxu0 %v2733_v9  ;;  %v132_v10 = vld [vmem:[%s4687_s2 + $0x110] sm:$0xff]  ;;  %v131_v12 = vld [vmem:[%s4687_s2 + $0x108] sm:$0xff]  ;;  %v130_v13 = vld [vmem:[%s4687_s2 + $0x100] sm:$0xff] }
  0x38   :  { %v56_v11 = vld [vmem:[%s4686_s1 + $0xb0] sm:$0xff]  ;;  %v57_v14 = vld [vmem:[%s4686_s1 + $0xb8] sm:$0xff]  ;;  %v58_v17 = vld [vmem:[%s4686_s1 + $0xc0] sm:$0xff] }
  0x39   :  { %v161_v15 = vld [vmem:[%s4687_s2 + $0x1f8] sm:$0xff]  ;;  %v160_v16 = vld [vmem:[%s4687_s2 + $0x1f0] sm:$0xff]  ;;  %v159_v18 = vld [vmem:[%s4687_s2 + $0x1e8] sm:$0xff] }
  0x3a   :  { %2590 = vmatmul.mubr.msk.f32.gmra.mxu0 %vm482_vm0, %v47_v47  ;;  %254 = vperm.xlu1 %2709, %v116_v49   ;;  %v158_v19 = vld [vmem:[%s4687_s2 + $0x1e0] sm:$0xff]  ;;  %v59_v20 = vld [vmem:[%s4686_s1 + $0xc8] sm:$0xff]  ;;  %v157_v21 = vld [vmem:[%s4687_s2 + $0x1d8] sm:$0xff] }
  0x3b   :  { %259 = vperm.xlu0 %2708, %v117_v48   ;;  %823 = vmatprep.mubr.f32.mxu0 %v2733_v9  ;;  %v156_v22 = vld [vmem:[%s4687_s2 + $0x1d0] sm:$0xff]  ;;  %v155_v24 = vld [vmem:[%s4687_s2 + $0x1c8] sm:$0xff]  ;;  %v154_v25 = vld [vmem:[%s4687_s2 + $0x1c0] sm:$0xff] }
  0x3c   :  { %v60_v23 = vld [vmem:[%s4686_s1 + $0xd0] sm:$0xff]  ;;  %v61_v26 = vld [vmem:[%s4686_s1 + $0xd8] sm:$0xff]  ;;  %v62_v29 = vld [vmem:[%s4686_s1 + $0xe0] sm:$0xff] }
  0x3d   :  { %v153_v27 = vld [vmem:[%s4687_s2 + $0x1b8] sm:$0xff]  ;;  %v152_v28 = vld [vmem:[%s4687_s2 + $0x1b0] sm:$0xff]  ;;  %v151_v30 = vld [vmem:[%s4687_s2 + $0x1a8] sm:$0xff] }
  0x3e   :  { %2591 = vmatmul.mubr.msk.f32.gmra.mxu0 %vm482_vm0, %v48_v50  ;;  %244 = vperm.xlu1 %2709, %v114_v52   ;;  %v150_v31 = vld [vmem:[%s4687_s2 + $0x1a0] sm:$0xff]  ;;  %v63_v32 = vld [vmem:[%s4686_s1 + $0xe8] sm:$0xff]  ;;  %v149_v33 = vld [vmem:[%s4687_s2 + $0x198] sm:$0xff] }
  0x3f   :  { %249 = vperm.xlu0 %2708, %v115_v51   ;;  %829 = vmatprep.mubr.f32.mxu0 %v2733_v9  ;;  %v148_v34 = vld [vmem:[%s4687_s2 + $0x190] sm:$0xff]  ;;  %v147_v36 = vld [vmem:[%s4687_s2 + $0x188] sm:$0xff]  ;;  %v146_v37 = vld [vmem:[%s4687_s2 + $0x180] sm:$0xff] }
  0x40   :  { %v64_v35 = vld [vmem:[%s4686_s1 + $0xf0] sm:$0xff]  ;;  %v65_v38 = vld [vmem:[%s4686_s1 + $0xf8] sm:$0xff]  ;;  %v66_v41 = vld [vmem:[%s4686_s1 + $0x100] sm:$0xff] }
  0x41   :  { %v1267_v39 = vld [vmem:[%s4689_s4 + $0x78] sm:$0xff]  ;;  %v1266_v42 = vld [vmem:[%s4689_s4 + $0x70] sm:$0xff]  ;;  %v67_v44 = vld [vmem:[%s4686_s1 + $0x108] sm:$0xff] }
  0x42   :  { %2592 = vmatmul.mubr.msk.f32.gmra.mxu0 %vm482_vm0, %v49_v53  ;;  %394 = vperm.xlu1 %2709, %v144_v55   ;;  %v1299_v40 = vld [vmem:[%s4689_s4 + $0x178] sm:$0xff]  ;;  %v1298_v43 = vld [vmem:[%s4689_s4 + $0x170] sm:$0xff]  ;;  %v1265_v45 = vld [vmem:[%s4689_s4 + $0x68] sm:$0xff] }
  0x43   :  { %399 = vperm.xlu0 %2708, %v145_v54   ;;  %835 = vmatprep.mubr.f32.mxu0 %v2733_v9  ;;  %v1297_v46 = vld [vmem:[%s4689_s4 + $0x168] sm:$0xff]  ;;  %v68_v47 = vld [vmem:[%s4686_s1 + $0x110] sm:$0xff]  ;;  %v1264_v48 = vld [vmem:[%s4689_s4 + $0x60] sm:$0xff] }
  0x44   :  { %v1296_v49 = vld [vmem:[%s4689_s4 + $0x160] sm:$0xff]  ;;  %v69_v50 = vld [vmem:[%s4686_s1 + $0x118] sm:$0xff]  ;;  %v1262_v54 = vld [vmem:[%s4689_s4 + $0x50] sm:$0xff] }
  0x45   :  { %v1263_v51 = vld [vmem:[%s4689_s4 + $0x58] sm:$0xff]  ;;  %v70_v53 = vld [vmem:[%s4686_s1 + $0x120] sm:$0xff]  ;;  %v1294_v55 = vld [vmem:[%s4689_s4 + $0x150] sm:$0xff] }
  0x46   :  { %2593 = vmatmul.mubr.msk.f32.gmra.mxu0 %vm482_vm0, %v50_v56  ;;  %384 = vperm.xlu1 %2709, %v142_v58   ;;  %v1295_v52 = vld [vmem:[%s4689_s4 + $0x158] sm:$0xff]  ;;  %v71_v56 = vld [vmem:[%s4686_s1 + $0x128] sm:$0xff] }
  0x47   :  { %389 = vperm.xlu0 %2708, %v143_v57   ;;  %841 = vmatprep.mubr.f32.mxu0 %v2733_v9  ;;  %v1261_v57 = vld [vmem:[%s4689_s4 + $0x48] sm:$0xff] }
  0x48   :  { %v1293_v58 = vld [vmem:[%s4689_s4 + $0x148] sm:$0xff] }
  0x4a   :  { %2594 = vmatmul.mubr.msk.f32.gmra.mxu0 %vm482_vm0, %v51_v59  ;;  %374 = vperm.xlu1 %2709, %v140_v61   ;;  %v72_v59 = vld [vmem:[%s4686_s1 + $0x130] sm:$0xff]  ;;  %v1292_v61 = vld [vmem:[%s4689_s4 + $0x140] sm:$0xff] }
  0x4b   :  { %379 = vperm.xlu0 %2708, %v141_v60   ;;  %847 = vmatprep.mubr.f32.mxu0 %v2733_v9  ;;  %v1260_v60 = vld [vmem:[%s4689_s4 + $0x40] sm:$0xff] }
  0x4e   :  { %2595 = vmatmul.mubr.msk.f32.gmra.mxu0 %vm482_vm0, %v52_v62  ;;  %364 = vperm.xlu1 %2709, %v138_v0   ;;  %v73_v62 = vld [vmem:[%s4686_s1 + $0x138] sm:$0xff] }
  0x4f   :  { %369 = vperm.xlu0 %2708, %v139_v63   ;;  %853 = vmatprep.mubr.f32.mxu0 %v2733_v9  ;;  %v1259_v63 = vld [vmem:[%s4689_s4 + $0x38] sm:$0xff] }
  0x50   :  { %v1291_v0 = vld [vmem:[%s4689_s4 + $0x138] sm:$0xff] }
  0x52   :  { %2596 = vmatmul.mubr.msk.f32.gmra.mxu0 %vm482_vm0, %v53_v1  ;;  %354 = vperm.xlu1 %2709, %v136_v3   ;;  %v74_v1 = vld [vmem:[%s4686_s1 + $0x140] sm:$0xff]  ;;  %v1290_v3 = vld [vmem:[%s4689_s4 + $0x130] sm:$0xff] }
  0x53   :  { %359 = vperm.xlu0 %2708, %v137_v2   ;;  %859 = vmatprep.mubr.f32.mxu0 %v2733_v9  ;;  %v1258_v2 = vld [vmem:[%s4689_s4 + $0x30] sm:$0xff] }
  0x56   :  { %2597 = vmatmul.mubr.msk.f32.gmra.mxu0 %vm482_vm0, %v54_v4  ;;  %344 = vperm.xlu1 %2709, %v134_v6   ;;  %v75_v4 = vld [vmem:[%s4686_s1 + $0x148] sm:$0xff] }
  0x57   :  { %349 = vperm.xlu0 %2708, %v135_v5   ;;  %865 = vmatprep.mubr.f32.mxu0 %v2733_v9  ;;  %v1257_v5 = vld [vmem:[%s4689_s4 + $0x28] sm:$0xff] }
  0x5a   :  { %2598 = vmatmul.mubr.msk.f32.gmra.mxu0 %vm482_vm0, %v55_v7  ;;  %334 = vperm.xlu1 %2709, %v132_v10   ;;  %v1289_v7 = vld [vmem:[%s4689_s4 + $0x128] sm:$0xff]  ;;  %v76_v10 = vld [vmem:[%s4686_s1 + $0x150] sm:$0xff] }
  0x5b   :  { %339 = vperm.xlu0 %2708, %v133_v8   ;;  %871 = vmatprep.mubr.f32.mxu0 %v2733_v9 }
  0x5e   :  { %2599 = vmatmul.mubr.msk.f32.gmra.mxu0 %vm482_vm0, %v56_v11  ;;  %324 = vperm.xlu1 %2709, %v130_v13   ;;  %v1256_v11 = vld [vmem:[%s4689_s4 + $0x20] sm:$0xff] }
  0x5f   :  { %329 = vperm.xlu0 %2708, %v131_v12   ;;  %877 = vmatprep.mubr.f32.mxu0 %v2733_v9  ;;  %v1288_v12 = vld [vmem:[%s4689_s4 + $0x120] sm:$0xff] }
  0x62   :  { %2600 = vmatmul.mubr.msk.f32.gmra.mxu0 %vm482_vm0, %v57_v14  ;;  %474 = vperm.xlu1 %2709, %v160_v16   ;;  %v77_v14 = vld [vmem:[%s4686_s1 + $0x158] sm:$0xff] }
  0x63   :  { %479 = vperm.xlu0 %2708, %v161_v15   ;;  %883 = vmatprep.mubr.f32.mxu0 %v2733_v9  ;;  %v1255_v15 = vld [vmem:[%s4689_s4 + $0x18] sm:$0xff] }
  0x64   :  { %v1287_v16 = vld [vmem:[%s4689_s4 + $0x118] sm:$0xff] }
  0x66   :  { %2601 = vmatmul.mubr.msk.f32.gmra.mxu0 %vm482_vm0, %v58_v17  ;;  %464 = vperm.xlu1 %2709, %v158_v19   ;;  %v1254_v19 = vld [vmem:[%s4689_s4 + $0x10] sm:$0xff] }
  0x67   :  { %469 = vperm.xlu0 %2708, %v159_v18   ;;  %889 = vmatprep.mubr.f32.mxu0 %v2733_v9  ;;  %v78_v18 = vld [vmem:[%s4686_s1 + $0x160] sm:$0xff] }
  0x6a   :  { %2602 = vmatmul.mubr.msk.f32.gmra.mxu0 %vm482_vm0, %v59_v20  ;;  %454 = vperm.xlu1 %2709, %v156_v22  }
  0x6b   :  { %459 = vperm.xlu0 %2708, %v157_v21   ;;  %895 = vmatprep.mubr.f32.mxu0 %v2733_v9  ;;  %v1286_v21 = vld [vmem:[%s4689_s4 + $0x110] sm:$0xff] }
  0x6e   :  { %2603 = vmatmul.mubr.msk.f32.gmra.mxu0 %vm482_vm0, %v60_v23  ;;  %444 = vperm.xlu1 %2709, %v154_v25   ;;  %v79_v23 = vld [vmem:[%s4686_s1 + $0x168] sm:$0xff] }
  0x6f   :  { %449 = vperm.xlu0 %2708, %v155_v24   ;;  %901 = vmatprep.mubr.f32.mxu0 %v2733_v9  ;;  %v1253_v24 = vld [vmem:[%s4689_s4 + $0x8] sm:$0xff] }
  0x70   :  { %v1285_v25 = vld [vmem:[%s4689_s4 + $0x108] sm:$0xff] }
  0x72   :  { %2604 = vmatmul.mubr.msk.f32.gmra.mxu0 %vm482_vm0, %v61_v26  ;;  %434 = vperm.xlu1 %2709, %v152_v28   ;;  %v1252_v28 = vld [vmem:[%s4689_s4] sm:$0xff] }
  0x73   :  { %439 = vperm.xlu0 %2708, %v153_v27   ;;  %907 = vmatprep.mubr.f32.mxu0 %v2733_v9  ;;  %v80_v27 = vld [vmem:[%s4686_s1 + $0x170] sm:$0xff] }
  0x76   :  { %2605 = vmatmul.mubr.msk.f32.gmra.mxu0 %vm482_vm0, %v62_v29  ;;  %424 = vperm.xlu1 %2709, %v150_v31   ;;  %v1284_v29 = vld [vmem:[%s4689_s4 + $0x100] sm:$0xff]  ;;  %v81_v31 = vld [vmem:[%s4686_s1 + $0x178] sm:$0xff] }
  0x77   :  { %429 = vperm.xlu0 %2708, %v151_v30   ;;  %913 = vmatprep.mubr.f32.mxu0 %v2733_v9 }
  0x7a   :  { %2606 = vmatmul.mubr.msk.f32.gmra.mxu0 %vm482_vm0, %v63_v32  ;;  %414 = vperm.xlu1 %2709, %v148_v34   ;;  %v1283_v32 = vld [vmem:[%s4689_s4 + $0xf8] sm:$0xff] }
  0x7b   :  { %419 = vperm.xlu0 %2708, %v149_v33   ;;  %919 = vmatprep.mubr.f32.mxu0 %v2733_v9  ;;  %v1315_v34 = vld [vmem:[%s4689_s4 + $0x1f8] sm:$0xff] }
  0x7d   :  { %v3262_v8 = vpop.permute.xlu1 %229 }
  0x7e   :  { %2607 = vmatmul.mubr.msk.f32.gmra.mxu0 %vm482_vm0, %v64_v35  ;;  %404 = vperm.xlu1 %2709, %v146_v37   ;;  %v3256_v6 = vpop.permute.xlu0 %239  ;;  %v1282_v37 = vld [vmem:[%s4689_s4 + $0xf0] sm:$0xff] }
  0x7f   :  { %409 = vperm.xlu0 %2708, %v147_v36   ;;  %925 = vmatprep.mubr.f32.mxu0 %v2733_v9  ;;  %v82_v36 = vld [vmem:[%s4686_s1 + $0x180] sm:$0xff] }
  0x81   :  { %v3287_v17 = vpop.permute.xlu1 %224 }
  0x82   :  { %2608 = vmatmul.mubr.msk.f32.gmra.mxu0 %vm482_vm0, %v65_v38  ;;  %2003 = vperm.xlu1 %2709, %v1299_v40   ;;  %v3274_v13 = vpop.permute.xlu0 %234  ;;  %v1314_v38 = vld [vmem:[%s4689_s4 + $0x1f0] sm:$0xff] }
  0x83   :  { %1457 = vperm.xlu0 %2708, %v1267_v39   ;;  %931 = vmatprep.mubr.f32.mxu0 %v2733_v9 }
  0x85   :  { %v3303_v22 = vpop.permute.xlu1 %214 }
  0x86   :  { %2609 = vmatmul.mubr.msk.f32.gmra.mxu0 %vm482_vm0, %v66_v41  ;;  %1998 = vperm.xlu1 %2709, %v1298_v43   ;;  %v3297_v20 = vpop.permute.xlu0 %219  ;;  %v83_v41 = vld [vmem:[%s4686_s1 + $0x188] sm:$0xff] }
  0x87   :  { %1452 = vperm.xlu0 %2708, %v1266_v42   ;;  %937 = vmatprep.mubr.f32.mxu0 %v2733_v9  ;;  %v1281_v42 = vld [vmem:[%s4689_s4 + $0xe8] sm:$0xff] }
  0x89   :  { %v3328_v30 = vpop.permute.xlu1 %204 }
  0x8a   :  { %2610 = vmatmul.mubr.msk.f32.gmra.mxu0 %vm482_vm0, %v67_v44  ;;  %1993 = vperm.xlu1 %2709, %v1297_v46   ;;  %v3315_v26 = vpop.permute.xlu0 %209  ;;  %v1313_v44 = vld [vmem:[%s4689_s4 + $0x1e8] sm:$0xff] }
  0x8b   :  { %1447 = vperm.xlu0 %2708, %v1265_v45   ;;  %943 = vmatprep.mubr.f32.mxu0 %v2733_v9 }
  0x8d   :  { %v3344_v35 = vpop.permute.xlu1 %194 }
  0x8e   :  { %2611 = vmatmul.mubr.msk.f32.gmra.mxu0 %vm482_vm0, %v68_v47  ;;  %1988 = vperm.xlu1 %2709, %v1296_v49   ;;  %v3338_v33 = vpop.permute.xlu0 %199  ;;  %v84_v47 = vld [vmem:[%s4686_s1 + $0x190] sm:$0xff] }
  0x8f   :  { %1442 = vperm.xlu0 %2708, %v1264_v48   ;;  %949 = vmatprep.mubr.f32.mxu0 %v2733_v9  ;;  %v1280_v48 = vld [vmem:[%s4689_s4 + $0xe0] sm:$0xff] }
  0x91   :  { %v3373_v45 = vpop.permute.xlu1 %184 }
  0x92   :  { %2612 = vmatmul.mubr.msk.f32.gmra.mxu0 %vm482_vm0, %v69_v50  ;;  %1983 = vperm.xlu1 %2709, %v1295_v52   ;;  %v3356_v39 = vpop.permute.xlu0 %189 }
  0x93   :  { %1437 = vperm.xlu0 %2708, %v1263_v51   ;;  %955 = vmatprep.mubr.f32.mxu0 %v2733_v9  ;;  %v1312_v51 = vld [vmem:[%s4689_s4 + $0x1e0] sm:$0xff] }
  0x96   :  { %2613 = vmatmul.mubr.msk.f32.gmra.mxu0 %vm482_vm0, %v70_v53  ;;  %1978 = vperm.xlu1 %2709, %v1294_v55   ;;  %v3385_v49 = vpop.permute.xlu0 %179  ;;  %v3395_v53 = vpop.permute.xlu1 %174  ;;  %v1279_v55 = vld [vmem:[%s4689_s4 + $0xd8] sm:$0xff] }
  0x97   :  { %1432 = vperm.xlu0 %2708, %v1262_v54   ;;  %961 = vmatprep.mubr.f32.mxu0 %v2733_v9  ;;  %v85_v54 = vld [vmem:[%s4686_s1 + $0x198] sm:$0xff] }
  0x9a   :  { %2614 = vmatmul.mubr.msk.f32.gmra.mxu0 %vm482_vm0, %v71_v56  ;;  %1973 = vperm.xlu1 %2709, %v1293_v58   ;;  %v3409_v58 = vpop.permute.xlu0 %169 }
  0x9b   :  { %1427 = vperm.xlu0 %2708, %v1261_v57   ;;  %967 = vmatprep.mubr.f32.mxu0 %v2733_v9  ;;  %v1311_v57 = vld [vmem:[%s4689_s4 + $0x1d8] sm:$0xff] }
  0x9e   :  { %2615 = vmatmul.mubr.msk.f32.gmra.mxu0 %vm482_vm0, %v72_v59  ;;  %1968 = vperm.xlu1 %2709, %v1292_v61   ;;  %v1278_v61 = vld [vmem:[%s4689_s4 + $0xd0] sm:$0xff] }
  0x9f   :  { %1422 = vperm.xlu0 %2708, %v1260_v60   ;;  %973 = vmatprep.mubr.f32.mxu0 %v2733_v9  ;;  %v86_v60 = vld [vmem:[%s4686_s1 + $0x1a0] sm:$0xff] }
  0xa2   :  { %2616 = vmatmul.mubr.msk.f32.gmra.mxu0 %vm482_vm0, %v73_v62  ;;  %1963 = vperm.xlu1 %2709, %v1291_v0   ;;  %v3426_v0 = vpop.permute.xlu1 %164 }
  0xa3   :  { %1417 = vperm.xlu0 %2708, %v1259_v63   ;;  %979 = vmatprep.mubr.f32.mxu0 %v2733_v9  ;;  %v1310_v63 = vld [vmem:[%s4689_s4 + $0x1d0] sm:$0xff] }
  0xa6   :  { %2617 = vmatmul.mubr.msk.f32.gmra.mxu0 %vm482_vm0, %v74_v1  ;;  %1958 = vperm.xlu1 %2709, %v1290_v3   ;;  %v1277_v3 = vld [vmem:[%s4689_s4 + $0xc8] sm:$0xff] }
  0xa7   :  { %1412 = vperm.xlu0 %2708, %v1258_v2   ;;  %985 = vmatprep.mubr.f32.mxu0 %v2733_v9  ;;  %v87_v2 = vld [vmem:[%s4686_s1 + $0x1a8] sm:$0xff] }
  0xaa   :  { %2618 = vmatmul.mubr.msk.f32.gmra.mxu0 %vm482_vm0, %v75_v4  ;;  %1953 = vperm.xlu1 %2709, %v1289_v7   ;;  %v3438_v4 = vpop.permute.xlu0 %319  ;;  %v1309_v7 = vld [vmem:[%s4689_s4 + $0x1c8] sm:$0xff] }
  0xab   :  { %1407 = vperm.xlu0 %2708, %v1257_v5   ;;  %991 = vmatprep.mubr.f32.mxu0 %v2733_v9 }
  0xae   :  { %2619 = vmatmul.mubr.msk.f32.gmra.mxu0 %vm482_vm0, %v76_v10  ;;  %1948 = vperm.xlu1 %2709, %v1288_v12   ;;  %v88_v12 = vld [vmem:[%s4686_s1 + $0x1b0] sm:$0xff] }
  0xaf   :  { %1402 = vperm.xlu0 %2708, %v1256_v11   ;;  %997 = vmatprep.mubr.f32.mxu0 %v2733_v9  ;;  %v3448_v11 = vpop.permute.xlu1 %314 }
  0xb2   :  { %2620 = vmatmul.mubr.msk.f32.gmra.mxu0 %vm482_vm0, %v77_v14  ;;  %1943 = vperm.xlu1 %2709, %v1287_v16   ;;  %v1276_v14 = vld [vmem:[%s4689_s4 + $0xc0] sm:$0xff] }
  0xb3   :  { %1397 = vperm.xlu0 %2708, %v1255_v15   ;;  %1003 = vmatprep.mubr.f32.mxu0 %v2733_v9  ;;  %v1308_v16 = vld [vmem:[%s4689_s4 + $0x1c0] sm:$0xff] }
  0xb6   :  { %2621 = vmatmul.mubr.msk.f32.gmra.mxu0 %vm482_vm0, %v78_v18  ;;  %1938 = vperm.xlu1 %2709, %v1286_v21   ;;  %v3462_v18 = vpop.permute.xlu0 %309  ;;  %v89_v21 = vld [vmem:[%s4686_s1 + $0x1b8] sm:$0xff] }
  0xb7   :  { %1392 = vperm.xlu0 %2708, %v1254_v19   ;;  %1009 = vmatprep.mubr.f32.mxu0 %v2733_v9 }
  0xba   :  { %2622 = vmatmul.mubr.msk.f32.gmra.mxu0 %vm482_vm0, %v79_v23  ;;  %1933 = vperm.xlu1 %2709, %v1285_v25   ;;  %v1275_v23 = vld [vmem:[%s4689_s4 + $0xb8] sm:$0xff] }
  0xbb   :  { %1387 = vperm.xlu0 %2708, %v1253_v24   ;;  %1015 = vmatprep.mubr.f32.mxu0 %v2733_v9  ;;  %v1307_v25 = vld [vmem:[%s4689_s4 + $0x1b8] sm:$0xff] }
  0xbe   :  { %2623 = vmatmul.mubr.msk.f32.gmra.mxu0 %vm482_vm0, %v80_v27  ;;  %1928 = vperm.xlu1 %2709, %v1284_v29   ;;  %v3479_v27 = vpop.permute.xlu1 %304  ;;  %v90_v29 = vld [vmem:[%s4686_s1 + $0x1c0] sm:$0xff] }
  0xbf   :  { %1382 = vperm.xlu0 %2708, %v1252_v28   ;;  %1021 = vmatprep.mubr.f32.mxu0 %v2733_v9 }
  0xc2   :  { %2624 = vmatmul.mubr.msk.f32.gmra.mxu0 %vm482_vm0, %v81_v31  ;;  %2083 = vperm.xlu1 %2709, %v1315_v34   ;;  %v1274_v31 = vld [vmem:[%s4689_s4 + $0xb0] sm:$0xff] }
  0xc3   :  { %1537 = vperm.xlu0 %2708, %v1283_v32   ;;  %1027 = vmatprep.mubr.f32.mxu0 %v2733_v9  ;;  %v3491_v32 = vpop.permute.xlu0 %299 }
  0xc4   :  { %4705 = vst [vmem:[#allocation5_spill] sm:$0xff] %v3491_v32 }
  0xc6   :  { %v3358_v40 = vpop.f32.mrf.mxu0  ;;  %2625 = vmatmul.mubr.msk.f32.gmra.mxu0 %vm482_vm0, %v82_v36  ;;  %2078 = vperm.xlu1 %2709, %v1314_v38   ;;  %v1306_v36 = vld [vmem:[%s4689_s4 + $0x1b0] sm:$0xff]  ;;  %v3501_v38 = vpop.permute.xlu1 %294 }
  0xc7   :  { %1532 = vperm.xlu0 %2708, %v1282_v37   ;;  %1033 = vmatprep.mubr.f32.mxu0 %v2733_v9  ;;  %4706 = vst [vmem:[#allocation6_spill] sm:$0xff] %v3501_v38 }
  0xc8   :  { %v3368_v43 = vpop.f32.mrf.mxu0 }
  0xca   :  { %v3375_v46 = vpop.f32.mrf.mxu0  ;;  %2626 = vmatmul.mubr.msk.f32.gmra.mxu0 %vm482_vm0, %v83_v41  ;;  %2073 = vperm.xlu1 %2709, %v1313_v44   ;;  %v91_v41 = vld [vmem:[%s4686_s1 + $0x1c8] sm:$0xff] }
  0xcb   :  { %1527 = vperm.xlu0 %2708, %v1281_v42   ;;  %1039 = vmatprep.mubr.f32.mxu0 %v2733_v9  ;;  %v1273_v42 = vld [vmem:[%s4689_s4 + $0xa8] sm:$0xff] }
  0xcc   :  { %v3387_v50 = vpop.f32.mrf.mxu0  ;;  %v1317_v44 = vld [vmem:[%s4688_s3 + $0x8] sm:$0xff] }
  0xcd   :  { %1604 = vmatprep.mubr.f32.mxu1 %v1317_v44  ;;  %v95_v44 = vld [vmem:[%s4686_s1 + $0x1e8] sm:$0xff] }
  0xce   :  { %v3392_v52 = vpop.f32.mrf.mxu0  ;;  %2627 = vmatmul.mubr.msk.f32.gmra.mxu0 %vm482_vm0, %v84_v47  ;;  %2068 = vperm.xlu1 %2709, %v1312_v51   ;;  %v3518_v51 = vpop.permute.xlu0 %289 }
  0xcf   :  { %1522 = vperm.xlu0 %2708, %v1280_v48   ;;  %1045 = vmatprep.mubr.f32.mxu0 %v2733_v9  ;;  %v1305_v48 = vld [vmem:[%s4689_s4 + $0x1a8] sm:$0xff]  ;;  %4707 = vst [vmem:[#allocation7_spill] sm:$0xff] %v3518_v51 }
  0xd0   :  { %v3404_v56 = vpop.f32.mrf.mxu0 }
  0xd2   :  { %v3411_v59 = vpop.f32.mrf.mxu0  ;;  %2628 = vmatmul.mubr.msk.f32.gmra.mxu0 %vm482_vm0, %v85_v54  ;;  %2063 = vperm.xlu1 %2709, %v1311_v57   ;;  %v1272_v57 = vld [vmem:[%s4689_s4 + $0xa0] sm:$0xff] }
  0xd3   :  { %1517 = vperm.xlu0 %2708, %v1279_v55   ;;  %1051 = vmatprep.mubr.f32.mxu0 %v2733_v9  ;;  %v92_v55 = vld [vmem:[%s4686_s1 + $0x1d0] sm:$0xff] }
  0xd4   :  { %v3421_v62 = vpop.f32.mrf.mxu0 }
  0xd6   :  { %v3428_v1 = vpop.f32.mrf.mxu0  ;;  %2629 = vmatmul.mubr.msk.f32.gmra.mxu0 %vm482_vm0, %v86_v60  ;;  %2058 = vperm.xlu1 %2709, %v1310_v63   ;;  %v3535_v63 = vpop.permute.xlu1 %284 }
  0xd7   :  { %1512 = vperm.xlu0 %2708, %v1278_v61   ;;  %1057 = vmatprep.mubr.f32.mxu0 %v2733_v9  ;;  %v1304_v61 = vld [vmem:[%s4689_s4 + $0x1a0] sm:$0xff]  ;;  %4708 = vst [vmem:[#allocation8_spill] sm:$0xff] %v3535_v63 }
  0xd8   :  { %v3440_v5 = vpop.f32.mrf.mxu0 }
  0xda   :  { %v3445_v10 = vpop.f32.mrf.mxu0  ;;  %2630 = vmatmul.mubr.msk.f32.gmra.mxu0 %vm482_vm0, %v87_v2  ;;  %2053 = vperm.xlu1 %2709, %v1309_v7   ;;  %v1271_v7 = vld [vmem:[%s4689_s4 + $0x98] sm:$0xff] }
  0xdb   :  { %1507 = vperm.xlu0 %2708, %v1277_v3   ;;  %1063 = vmatprep.mubr.f32.mxu0 %v2733_v9  ;;  %v93_v3 = vld [vmem:[%s4686_s1 + $0x1d8] sm:$0xff] }
  0xdc   :  { %v3457_v15 = vpop.f32.mrf.mxu0 }
  0xde   :  { %v3464_v19 = vpop.f32.mrf.mxu0  ;;  %2631 = vmatmul.mubr.msk.f32.gmra.mxu0 %vm482_vm0, %v88_v12  ;;  %2048 = vperm.xlu1 %2709, %v1308_v16   ;;  %v3547_v12 = vpop.permute.xlu0 %279  ;;  %v1303_v16 = vld [vmem:[%s4689_s4 + $0x198] sm:$0xff] }
  0xdf   :  { %1502 = vperm.xlu0 %2708, %v1276_v14   ;;  %1069 = vmatprep.mubr.f32.mxu0 %v2733_v9  ;;  %4709 = vst [vmem:[#allocation9_spill] sm:$0xff] %v3547_v12 }
  0xe0   :  { %v3474_v24 = vpop.f32.mrf.mxu0 }
  0xe2   :  { %v3481_v28 = vpop.f32.mrf.mxu0  ;;  %2632 = vmatmul.mubr.msk.f32.gmra.mxu0 %vm482_vm0, %v89_v21  ;;  %2043 = vperm.xlu1 %2709, %v1307_v25   ;;  %v94_v25 = vld [vmem:[%s4686_s1 + $0x1e0] sm:$0xff] }
  0xe3   :  { %1497 = vperm.xlu0 %2708, %v1275_v23   ;;  %1075 = vmatprep.mubr.f32.mxu0 %v2733_v9  ;;  %v3557_v23 = vpop.permute.xlu1 %274 }
  0xe4   :  { %v3493_v34 = vpop.f32.mrf.mxu0  ;;  %4710 = vst [vmem:[#allocation10_spill] sm:$0xff] %v3557_v23 }
  0xe6   :  { %v3498_v37 = vpop.f32.mrf.mxu0  ;;  %2633 = vmatmul.mubr.msk.f32.gmra.mxu0 %vm482_vm0, %v90_v29  ;;  %2038 = vperm.xlu1 %2709, %v1306_v36   ;;  %v1270_v29 = vld [vmem:[%s4689_s4 + $0x90] sm:$0xff] }
  0xe7   :  { %1492 = vperm.xlu0 %2708, %v1274_v31   ;;  %1081 = vmatprep.mubr.f32.mxu0 %v2733_v9  ;;  %v1302_v36 = vld [vmem:[%s4689_s4 + $0x190] sm:$0xff] }
  0xe8   :  { %v3513_v47 = vpop.f32.mrf.mxu0 }
  0xea   :  { %v3520_v54 = vpop.f32.mrf.mxu0  ;;  %2634 = vmatmul.mubr.msk.f32.gmra.mxu0 %vm482_vm0, %v91_v41  ;;  %2033 = vperm.xlu1 %2709, %v1305_v48   ;;  %v3569_v41 = vpop.permute.xlu0 %269  ;;  %v1269_v48 = vld [vmem:[%s4689_s4 + $0x88] sm:$0xff] }
  0xeb   :  { %1487 = vperm.xlu0 %2708, %v1273_v42   ;;  %1087 = vmatprep.mubr.f32.mxu0 %v2733_v9  ;;  %4711 = vst [vmem:[#allocation11_spill] sm:$0xff] %v3569_v41 }
  0xec   :  { %v3530_v60 = vpop.f32.mrf.mxu0 }
  0xee   :  { %v3537_v2 = vpop.f32.mrf.mxu0  ;;  %2635 = vmatmul.mubr.msk.f32.gmra.mxu0 %vm482_vm0, %v92_v55  ;;  %2028 = vperm.xlu1 %2709, %v1304_v61   ;;  %v3582_v61 = vpop.permute.xlu1 %264 }
  0xef   :  { %1482 = vperm.xlu0 %2708, %v1272_v57   ;;  %1093 = vmatprep.mubr.f32.mxu0 %v2733_v9  ;;  %v1301_v57 = vld [vmem:[%s4689_s4 + $0x188] sm:$0xff]  ;;  %4712 = vst [vmem:[#allocation12_spill] sm:$0xff] %v3582_v61 }
  0xf0   :  { %v3549_v14 = vpop.f32.mrf.mxu0 }
  0xf2   :  { %v3554_v21 = vpop.f32.mrf.mxu0  ;;  %2636 = vmatmul.mubr.msk.f32.gmra.mxu0 %vm482_vm0, %v93_v3  ;;  %2023 = vperm.xlu1 %2709, %v1303_v16   ;;  %v1268_v16 = vld [vmem:[%s4689_s4 + $0x80] sm:$0xff] }
  0xf3   :  { %1477 = vperm.xlu0 %2708, %v1271_v7   ;;  %1099 = vmatprep.mubr.f32.mxu0 %v2733_v9  ;;  %v96_v7 = vld [vmem:[%s4686_s1 + $0x1f0] sm:$0xff] }
  0xf4   :  { %v809_v31 = vpop.f32.mrf.mxu0 }
  0xf6   :  { %v813_v42 = vpop.f32.mrf.mxu0  ;;  %2637 = vmatmul.mubr.msk.f32.gmra.mxu0 %vm482_vm0, %v94_v25  ;;  %2018 = vperm.xlu1 %2709, %v1302_v36   ;;  %v3592_v25 = vpop.permute.xlu0 %259  ;;  %v1300_v36 = vld [vmem:[%s4689_s4 + $0x180] sm:$0xff] }
  0xf7   :  { %1472 = vperm.xlu0 %2708, %v1270_v29   ;;  %1105 = vmatprep.mubr.f32.mxu0 %v2733_v9  ;;  %4713 = vst [vmem:[#allocation13_spill] sm:$0xff] %v3592_v25  ;;  %v2553_v25 = vld [vmem:[%s4692_s7] sm:$0xff] }
  0xf8   :  { %v815_v55 = vpop.f32.mrf.mxu0 }
  0xfa   :  { %v819_v3 = vpop.f32.mrf.mxu0  ;;  %2638 = vmatmul.mubr.msk.f32.gmra.mxu0 %vm482_vm0, %v95_v44  ;;  %2013 = vperm.xlu1 %2709, %v1301_v57   ;;  %v97_v57 = vld [vmem:[%s4686_s1 + $0x1f8] sm:$0xff]  ;;  %v3607_v41 = vpop.permute.xlu0 %249 }
  0xfb   :  { %1467 = vperm.xlu0 %2708, %v1269_v48   ;;  %1111 = vmatprep.mubr.f32.mxu0 %v2733_v9  ;;  %v3598_v48 = vpop.permute.xlu1 %254  ;;  %4715 = vst [vmem:[#allocation15_spill] sm:$0xff] %v3607_v41  ;;  %v820_v41 = vadd.f32 %v819_v3, %v3262_v8 }
  0xfc   :  { %v821_v29 = vpop.f32.mrf.mxu0  ;;  %4714 = vst [vmem:[#allocation14_spill] sm:$0xff] %v3598_v48 }
  0xfd   :  { %v822_v63 = vadd.f32 %v821_v29, %v3262_v8  ;;  %v808_v8 = vadd.f32 %v3554_v21, %v3297_v20  ;;  %v1150_v3 = vmax.f32 %v820_v41, 0.0  ;;  %v796_v21 = vadd.f32 %v3520_v54, %v3315_v26 }
  0xfe   :  { %v825_v44 = vpop.f32.mrf.mxu0  ;;  %2639 = vmatmul.mubr.msk.f32.gmra.mxu0 %vm482_vm0, %v96_v7  ;;  %2008 = vperm.xlu1 %2709, %v1300_v36   ;;  %v784_v54 = vadd.f32 %v3481_v28, %v3338_v33  ;;  %v772_v28 = vadd.f32 %v3445_v10, %v3356_v39  ;;  %v760_v10 = vadd.f32 %v3411_v59, %v3385_v49 }
  0xff   :  { %1462 = vperm.xlu0 %2708, %v1268_v16   ;;  %1117 = vmatprep.mubr.f32.mxu0 %v2733_v9  ;;  %v826_v48 = vadd.f32 %v825_v44, %v3274_v13  ;;  %v1151_v44 = vmax.f32 %v822_v63, 0.0  ;;  %v798_v63 = vadd.f32 %v3530_v60, %v3315_v26  ;;  %v786_v60 = vadd.f32 %v3493_v34, %v3338_v33 }
 0x100   :  { %v827_v61 = vpop.f32.mrf.mxu0  ;;  %v774_v34 = vadd.f32 %v3457_v15, %v3356_v39  ;;  %v762_v15 = vadd.f32 %v3421_v62, %v3385_v49  ;;  %v750_v62 = vadd.f32 %v3387_v50, %v3409_v58  ;;  %v748_v59 = vadd.f32 %v3375_v46, %v3409_v58 }
 0x101   :  { %v828_v9 = vadd.f32 %v827_v61, %v3274_v13  ;;  %v814_v61 = vadd.f32 %v813_v42, %v3287_v17  ;;  %v810_v13 = vadd.f32 %v809_v31, %v3297_v20  ;;  %v1146_v31 = vmax.f32 %v808_v8, 0.0 }
 0x102   :  { %v831_v23 = vpop.f32.mrf.mxu0  ;;  %2640 = vmatmul.mubr.msk.f32.gmra.mxu0 %vm482_vm0, %v97_v57  ;;  %v1152_v57 = vmax.f32 %v826_v48, 0.0  ;;  %v1143_v26 = vmax.f32 %v798_v63, 0.0  ;;  %v1139_v33 = vmax.f32 %v786_v60, 0.0  ;;  %v1135_v39 = vmax.f32 %v774_v34, 0.0 }
 0x103   :  { %2556 = vperm.xlu0 %2708, %v2553_v25   ;;  %v832_v7 = vadd.f32 %v831_v23, %v3256_v6  ;;  %v816_v25 = vadd.f32 %v815_v55, %v3287_v17  ;;  %v1153_v23 = vmax.f32 %v828_v9, 0.0  ;;  %v802_v17 = vadd.f32 %v3537_v2, %v3303_v22 }
 0x104   :  { %v833_v16 = vpop.f32.mrf.mxu0  ;;  %v1147_v20 = vmax.f32 %v810_v13, 0.0  ;;  %v790_v2 = vadd.f32 %v3498_v37, %v3328_v30  ;;  %v778_v37 = vadd.f32 %v3464_v19, %v3344_v35  ;;  %v766_v19 = vadd.f32 %v3428_v1, %v3373_v45 }
 0x105   :  { %v834_v36 = vadd.f32 %v833_v16, %v3256_v6  ;;  %v1154_v38 = vmax.f32 %v832_v7, 0.0  ;;  %v1149_v55 = vmax.f32 %v816_v25, 0.0  ;;  %v1144_v48 = vmax.f32 %v802_v17, 0.0 }
 0x106   :  { %v3614_v12 = vpop.f32.mrf.mxu0  ;;  %v1142_v16 = vmax.f32 %v796_v21, 0.0  ;;  %v754_v1 = vadd.f32 %v3392_v52, %v3395_v53  ;;  %v1131_v49 = vmax.f32 %v762_v15, 0.0  ;;  %v1127_v50 = vmax.f32 %v750_v62, 0.0 }
 0x107   :  { %v1155_v51 = vmax.f32 %v834_v36, 0.0  ;;  %v1140_v36 = vmax.f32 %v790_v2, 0.0 }
 0x108   :  { %v3618_v32 = vpop.f32.mrf.mxu0 }
 0x109   :  { %1540 = vmatprep.subr.mxu1 %v1155_v51  ;;  %v804_v51 = vadd.f32 %v3549_v14, %v3303_v22  ;;  %v792_v14 = vadd.f32 %v3513_v47, %v3328_v30  ;;  %v780_v47 = vadd.f32 %v3474_v24, %v3344_v35  ;;  %v768_v24 = vadd.f32 %v3440_v5, %v3373_v45 }
 0x10a   :  { %v3622_v6 = vpop.f32.mrf.mxu0  ;;  %1541 = vmatpush1.msra.mxu1 %v1154_v38  ;;  %v1148_v38 = vmax.f32 %v814_v61, 0.0  ;;  %v756_v5 = vadd.f32 %v3404_v56, %v3395_v53  ;;  %v744_v56 = vadd.f32 %v3368_v43, %v3426_v0  ;;  %v742_v53 = vadd.f32 %v3358_v40, %v3426_v0 }
 0x10b   :  { %1542 = vmatprep.subr.mxu1 %v1153_v23  ;;  %v1145_v22 = vmax.f32 %v804_v51, 0.0  ;;  %v1141_v30 = vmax.f32 %v792_v14, 0.0  ;;  %v1138_v23 = vmax.f32 %v784_v54, 0.0  ;;  %v1137_v35 = vmax.f32 %v780_v47, 0.0 }
 0x10c   :  { %v3627_v29 = vpop.f32.mrf.mxu0  ;;  %1543 = vmatpush1.msra.mxu1 %v1152_v57  ;;  %v1136_v57 = vmax.f32 %v778_v37, 0.0  ;;  %v1133_v45 = vmax.f32 %v768_v24, 0.0  ;;  %v1129_v52 = vmax.f32 %v756_v5, 0.0  ;;  %v1125_v58 = vmax.f32 %v744_v56, 0.0 }
 0x10d   :  { %1544 = vmatprep.subr.mxu1 %v1151_v44  ;;  %v1134_v44 = vmax.f32 %v772_v28, 0.0  ;;  %v1124_v21 = vmax.f32 %v742_v53, 0.0 }
 0x10e   :  { %v3633_v42 = vpop.f32.mrf.mxu0  ;;  %1545 = vmatpush1.msra.mxu1 %v1150_v3  ;;  %v1132_v3 = vmax.f32 %v766_v19, 0.0 }
 0x10f   :  { %1546 = vmatprep.subr.mxu1 %v1149_v55  ;;  %v1130_v55 = vmax.f32 %v760_v10, 0.0 }
 0x110   :  { %v3639_v41 = vpop.f32.mrf.mxu0  ;;  %1547 = vmatpush1.msra.mxu1 %v1148_v38  ;;  %v1128_v38 = vmax.f32 %v754_v1, 0.0 }
 0x111   :  { %1548 = vmatprep.subr.mxu1 %v1147_v20  ;;  %v1126_v20 = vmax.f32 %v748_v59, 0.0  ;;  %v4717_v59 = vld [vmem:[#allocation6_spill] sm:$0xff] }
 0x112   :  { %v3645_v7 = vpop.f32.mrf.mxu0  ;;  %1549 = vmatpush1.msra.mxu1 %v1146_v31 }
 0x113   :  { %1550 = vmatprep.subr.mxu1 %v1145_v22 }
 0x114   :  { %v3651_v9 = vpop.f32.mrf.mxu0  ;;  %1551 = vmatpush1.msra.mxu1 %v1144_v48 }
 0x115   :  { %1552 = vmatprep.subr.mxu1 %v1143_v26 }
 0x116   :  { %v3657_v25 = vpop.f32.mrf.mxu0  ;;  %1553 = vmatpush1.msra.mxu1 %v1142_v16 }
 0x117   :  { %1554 = vmatprep.subr.mxu1 %v1141_v30 }
 0x118   :  { %v3663_v61 = vpop.f32.mrf.mxu0  ;;  %1555 = vmatpush1.msra.mxu1 %v1140_v36 }
 0x119   :  { %1556 = vmatprep.subr.mxu1 %v1139_v33 }
 0x11a   :  { %v3669_v13 = vpop.f32.mrf.mxu0  ;;  %1557 = vmatpush1.msra.mxu1 %v1138_v23 }
 0x11b   :  { %1558 = vmatprep.subr.mxu1 %v1137_v35 }
 0x11c   :  { %v3675_v8 = vpop.f32.mrf.mxu0  ;;  %1559 = vmatpush1.msra.mxu1 %v1136_v57 }
 0x11d   :  { %1560 = vmatprep.subr.mxu1 %v1135_v39 }
 0x11e   :  { %v3681_v51 = vpop.f32.mrf.mxu0  ;;  %1561 = vmatpush1.msra.mxu1 %v1134_v44 }
 0x11f   :  { %1562 = vmatprep.subr.mxu1 %v1133_v45 }
 0x120   :  { %v3687_v17 = vpop.f32.mrf.mxu0  ;;  %1563 = vmatpush1.msra.mxu1 %v1132_v3 }
 0x121   :  { %1564 = vmatprep.subr.mxu1 %v1131_v49 }
 0x122   :  { %v3693_v63 = vpop.f32.mrf.mxu0  ;;  %1565 = vmatpush1.msra.mxu1 %v1130_v55 }
 0x123   :  { %1566 = vmatprep.subr.mxu1 %v1129_v52 }
 0x124   :  { %v3695_v46 = vpop.f32.mrf.mxu0  ;;  %1567 = vmatpush1.msra.mxu1 %v1128_v38  ;;  %v4718_v38 = vld [vmem:[#allocation7_spill] sm:$0xff] }
 0x125   :  { %1568 = vmatprep.subr.mxu1 %v1127_v50 }
 0x126   :  { %v885_v31 = vpop.f32.mrf.mxu0  ;;  %1569 = vmatpush1.msra.mxu1 %v1126_v20 }
 0x127   :  { %1570 = vmatprep.subr.mxu1 %v1125_v58 }
 0x128   :  { %v887_v43 = vpop.f32.mrf.mxu0  ;;  %1571 = vmatpush1.msra.mxu1 %v1124_v21 }
 0x12a   :  { %v891_v14 = vpop.f32.mrf.mxu0 }
 0x12b   :  { %v892_v58 = vadd.f32 %v891_v14, %v4718_v38 }
 0x12c   :  { %v893_v40 = vpop.f32.mrf.mxu0 }
 0x12d   :  { %v894_v50 = vadd.f32 %v893_v40, %v4718_v38 }
 0x12e   :  { %v897_v0 = vpop.f32.mrf.mxu0 }
 0x130   :  { %v899_v22 = vpop.f32.mrf.mxu0 }
 0x131   :  { %v900_v55 = vadd.f32 %v899_v22, %v4717_v59 }
 0x132   :  { %v903_v2 = vpop.f32.mrf.mxu0 }
 0x134   :  { %v905_v48 = vpop.f32.mrf.mxu0 }
 0x136   :  { %v909_v60 = vpop.f32.mrf.mxu0 }
 0x137   :  { %v910_v5 = vadd.f32 %v909_v60, %v3479_v27  ;;  %v1177_v60 = vmax.f32 %v900_v55, 0.0 }
 0x138   :  { %v911_v26 = vpop.f32.mrf.mxu0 }
 0x139   :  { %v912_v10 = vadd.f32 %v911_v26, %v3479_v27  ;;  %v898_v27 = vadd.f32 %v897_v0, %v4717_v59  ;;  %v1180_v52 = vmax.f32 %v910_v5, 0.0 }
 0x13a   :  { %v915_v54 = vpop.f32.mrf.mxu0 }
 0x13b   :  { %v916_v57 = vadd.f32 %v915_v54, %v3462_v18  ;;  %v1181_v56 = vmax.f32 %v912_v10, 0.0  ;;  %v1176_v26 = vmax.f32 %v898_v27, 0.0  ;;  %v245_v27 = vpop.permute.xlu1 %244 }
 0x13c   :  { %v917_v16 = vpop.f32.mrf.mxu0 }
 0x13d   :  { %v918_v35 = vadd.f32 %v917_v16, %v3462_v18  ;;  %v1182_v18 = vmax.f32 %v916_v57, 0.0  ;;  %v4720_v16 = vld [vmem:[#allocation9_spill] sm:$0xff] }
 0x13e   :  { %v921_v47 = vpop.f32.mrf.mxu0  ;;  %v882_v40 = vadd.f32 %v3695_v46, %v4720_v16  ;;  %v880_v14 = vadd.f32 %v3693_v63, %v4720_v16  ;;  %v4722_v46 = vld [vmem:[#allocation11_spill] sm:$0xff] }
 0x13f   :  { %v922_v23 = vadd.f32 %v921_v47, %v3448_v11  ;;  %v1183_v3 = vmax.f32 %v918_v35, 0.0  ;;  %v1175_v47 = vmax.f32 %v894_v50, 0.0  ;;  %v868_v35 = vadd.f32 %v3669_v13, %v4722_v46 }
 0x140   :  { %v923_v30 = vpop.f32.mrf.mxu0  ;;  %v1171_v63 = vmax.f32 %v882_v40, 0.0  ;;  %v840_v50 = vadd.f32 %v3618_v32, %v245_v27  ;;  %v1316_v32 = vld [vmem:[%s4688_s3] sm:$0xff]  ;;  %v1318_v40 = vld [vmem:[%s4688_s3 + $0x10] sm:$0xff] }
 0x141   :  { %v924_v33 = vadd.f32 %v923_v30, %v3448_v11  ;;  %v1184_v45 = vmax.f32 %v922_v23, 0.0  ;;  %v4716_v11 = vld [vmem:[#allocation5_spill] sm:$0xff]  ;;  %v1174_v30 = vmax.f32 %v892_v58, 0.0  ;;  %v870_v23 = vadd.f32 %v3675_v8, %v4722_v46  ;;  %v1325_v46 = vld [vmem:[%s4688_s3 + $0x48] sm:$0xff] }
 0x142   :  { %v927_v37 = vpop.f32.mrf.mxu0  ;;  %v906_v1 = vadd.f32 %v905_v48, %v4716_v11  ;;  %v904_v62 = vadd.f32 %v903_v2, %v4716_v11  ;;  %v4719_v48 = vld [vmem:[#allocation8_spill] sm:$0xff]  ;;  %v4724_v8 = vld [vmem:[#allocation13_spill] sm:$0xff] }
 0x143   :  { %v928_v36 = vadd.f32 %v927_v37, %v3438_v4  ;;  %v1185_v44 = vmax.f32 %v924_v33, 0.0  ;;  %v888_v22 = vadd.f32 %v887_v43, %v4719_v48  ;;  %v886_v0 = vadd.f32 %v885_v31, %v4719_v48  ;;  %v4721_v43 = vld [vmem:[#allocation10_spill] sm:$0xff] }
 0x144   :  { %v929_v34 = vpop.f32.mrf.mxu0  ;;  %v1179_v20 = vmax.f32 %v906_v1, 0.0  ;;  %v1178_v21 = vmax.f32 %v904_v62, 0.0  ;;  %v1167_v13 = vmax.f32 %v870_v23, 0.0  ;;  %v856_v11 = vadd.f32 %v3645_v7, %v4724_v8  ;;  %v400_v23 = vpop.permute.xlu0 %399 }
 0x145   :  { %v930_v28 = vadd.f32 %v929_v34, %v3438_v4  ;;  %v1186_v15 = vmax.f32 %v928_v36, 0.0  ;;  %v876_v36 = vadd.f32 %v3687_v17, %v4721_v43  ;;  %v1173_v31 = vmax.f32 %v888_v22, 0.0  ;;  %v4723_v17 = vld [vmem:[#allocation12_spill] sm:$0xff] }
 0x146   :  { %v3701_v24 = vpop.f32.mrf.mxu0  ;;  %v874_v34 = vadd.f32 %v3681_v51, %v4721_v43  ;;  %v1172_v33 = vmax.f32 %v886_v0, 0.0  ;;  %v862_v10 = vadd.f32 %v3657_v25, %v4723_v17  ;;  %v1166_v1 = vmax.f32 %v868_v35, 0.0  ;;  %v1320_v43 = vld [vmem:[%s4688_s3 + $0x20] sm:$0xff]  ;;  %v395_v35 = vpop.permute.xlu1 %394 }
 0x147   :  { %v1187_v19 = vmax.f32 %v930_v28, 0.0  ;;  %v1169_v51 = vmax.f32 %v876_v36, 0.0  ;;  %v1162_v38 = vmax.f32 %v856_v11, 0.0  ;;  %v1323_v36 = vld [vmem:[%s4688_s3 + $0x38] sm:$0xff] }
 0x148   :  { %v3705_v39 = vpop.f32.mrf.mxu0  ;;  %v1164_v59 = vmax.f32 %v862_v10, 0.0  ;;  %v390_v10 = vpop.permute.xlu0 %389 }
 0x149   :  { %1572 = vmatprep.subr.mxu1 %v1187_v19  ;;  %v1170_v19 = vmax.f32 %v880_v14, 0.0 }
 0x14a   :  { %v3709_v4 = vpop.f32.mrf.mxu0  ;;  %1573 = vmatpush2.msra.mxu1 %v1186_v15  ;;  %v864_v15 = vadd.f32 %v3663_v61, %v4723_v17  ;;  %v4725_v61 = vld [vmem:[#allocation14_spill] sm:$0xff]  ;;  %v1324_v17 = vld [vmem:[%s4688_s3 + $0x40] sm:$0xff] }
 0x14b   :  { %1574 = vmatprep.subr.mxu1 %v1185_v44  ;;  %v1168_v44 = vmax.f32 %v874_v34, 0.0  ;;  %v852_v62 = vadd.f32 %v3639_v41, %v4725_v61 }
 0x14c   :  { %v3713_v49 = vpop.f32.mrf.mxu0  ;;  %1575 = vmatpush2.msra.mxu1 %v1184_v45  ;;  %v858_v45 = vadd.f32 %v3651_v9, %v4724_v8  ;;  %v1165_v25 = vmax.f32 %v864_v15, 0.0  ;;  %v4726_v9 = vld [vmem:[#allocation15_spill] sm:$0xff]  ;;  %v1327_v15 = vld [vmem:[%s4688_s3 + $0x58] sm:$0xff]  ;;  %v1326_v8 = vld [vmem:[%s4688_s3 + $0x50] sm:$0xff] }
 0x14d   :  { %1576 = vmatprep.subr.mxu1 %v1183_v3 }
 0x14e   :  { %v3717_v53 = vpop.f32.mrf.mxu0  ;;  %1577 = vmatpush2.msra.mxu1 %v1182_v18  ;;  %v850_v18 = vadd.f32 %v3633_v42, %v4725_v61  ;;  %v1163_v7 = vmax.f32 %v858_v45, 0.0  ;;  %v1161_v42 = vmax.f32 %v852_v62, 0.0  ;;  %v1329_v45 = vld [vmem:[%s4688_s3 + $0x68] sm:$0xff]  ;;  %v1328_v61 = vld [vmem:[%s4688_s3 + $0x60] sm:$0xff]  ;;  %v1331_v62 = vld [vmem:[%s4688_s3 + $0x78] sm:$0xff] }
 0x14f   :  { %1578 = vmatprep.subr.mxu1 %v1181_v56  ;;  %v846_v56 = vadd.f32 %v3627_v29, %v4726_v9 }
 0x150   :  { %v3721_v2 = vpop.f32.mrf.mxu0  ;;  %1579 = vmatpush2.msra.mxu1 %v1180_v52  ;;  %v844_v52 = vadd.f32 %v3622_v6, %v4726_v9  ;;  %v1160_v58 = vmax.f32 %v850_v18, 0.0  ;;  %v1157_v6 = vmax.f32 %v840_v50, 0.0 }
 0x151   :  { %1580 = vmatprep.subr.mxu1 %v1179_v20  ;;  %v838_v20 = vadd.f32 %v3614_v12, %v245_v27  ;;  %v1159_v29 = vmax.f32 %v846_v56, 0.0  ;;  %v1319_v12 = vld [vmem:[%s4688_s3 + $0x18] sm:$0xff]  ;;  %v1330_v56 = vld [vmem:[%s4688_s3 + $0x70] sm:$0xff] }
 0x152   :  { %v3725_v54 = vpop.f32.mrf.mxu0  ;;  %1581 = vmatpush2.msra.mxu1 %v1178_v21  ;;  %v1158_v48 = vmax.f32 %v844_v52, 0.0 }
 0x153   :  { %1582 = vmatprep.subr.mxu1 %v1177_v60  ;;  %v1156_v60 = vmax.f32 %v838_v20, 0.0 }
 0x154   :  { %v3731_v37 = vpop.f32.mrf.mxu0  ;;  %1583 = vmatpush2.msra.mxu1 %v1176_v26 }
 0x155   :  { %1584 = vmatprep.subr.mxu1 %v1175_v47  ;;  %v1321_v47 = vld [vmem:[%s4688_s3 + $0x28] sm:$0xff] }
 0x156   :  { %v3737_v28 = vpop.f32.mrf.mxu0  ;;  %1585 = vmatpush2.msra.mxu1 %v1174_v30 }
 0x157   :  { %1586 = vmatprep.subr.mxu1 %v1173_v31 }
 0x158   :  { %v3743_v57 = vpop.f32.mrf.mxu0  ;;  %1587 = vmatpush2.msra.mxu1 %v1172_v33  ;;  %v1322_v33 = vld [vmem:[%s4688_s3 + $0x30] sm:$0xff] }
 0x159   :  { %1588 = vmatprep.subr.mxu1 %v1171_v63 }
 0x15a   :  { %v3749_v5 = vpop.f32.mrf.mxu0  ;;  %1589 = vmatpush2.msra.mxu1 %v1170_v19 }
 0x15b   :  { %1590 = vmatprep.subr.mxu1 %v1169_v51 }
 0x15c   :  { %v3755_v3 = vpop.f32.mrf.mxu0  ;;  %1591 = vmatpush2.msra.mxu1 %v1168_v44 }
 0x15d   :  { %1592 = vmatprep.subr.mxu1 %v1167_v13  ;;  %v385_v13 = vpop.permute.xlu1 %384 }
 0x15e   :  { %v3761_v55 = vpop.f32.mrf.mxu0  ;;  %1593 = vmatpush2.msra.mxu1 %v1166_v1 }
 0x15f   :  { %1594 = vmatprep.subr.mxu1 %v1165_v25  ;;  %v380_v25 = vpop.permute.xlu0 %379 }
 0x160   :  { %v3767_v41 = vpop.f32.mrf.mxu0  ;;  %1595 = vmatpush2.msra.mxu1 %v1164_v59 }
 0x161   :  { %1596 = vmatprep.subr.mxu1 %v1163_v7  ;;  %v375_v59 = vpop.permute.xlu1 %374  ;;  %v1333_v7 = vld [vmem:[%s4688_s3 + $0x88] sm:$0xff] }
 0x162   :  { %v3771_v21 = vpop.f32.mrf.mxu0  ;;  %1597 = vmatpush2.msra.mxu1 %v1162_v38 }
 0x163   :  { %1598 = vmatprep.subr.mxu1 %v1161_v42  ;;  %v370_v42 = vpop.permute.xlu0 %369 }
 0x164   :  { %v3773_v22 = vpop.f32.mrf.mxu0  ;;  %1599 = vmatpush2.msra.mxu1 %v1160_v58 }
 0x165   :  { %1600 = vmatprep.subr.mxu1 %v1159_v29  ;;  %v1332_v29 = vld [vmem:[%s4688_s3 + $0x80] sm:$0xff] }
 0x166   :  { %v3775_v0 = vpop.f32.mrf.mxu0  ;;  %1601 = vmatpush2.msra.mxu1 %v1158_v48 }
 0x167   :  { %1602 = vmatprep.subr.mxu1 %v1157_v6 }
 0x168   :  { %v3783_v26 = vpop.f32.mrf.mxu0  ;;  %1603 = vmatpush2.msra.mxu1 %v1156_v60  ;;  %v1335_v60 = vld [vmem:[%s4688_s3 + $0x98] sm:$0xff] }
 0x169   :  { %1605 = vmatmul.mubr.f32.vlgmr.msra.gmra.mxu1 %v1316_v32  ;;  %v365_v32 = vpop.permute.xlu1 %364 }
 0x16a   :  { %v3785_v16 = vpop.f32.mrf.mxu0  ;;  %1610 = vmatprep.mubr.f32.mxu1 %v1319_v12 }
 0x16c   :  { %v3793_v14 = vpop.f32.mrf.mxu0 }
 0x16d   :  { %1611 = vmatmul.mubr.f32.gmra.mxu1 %v1318_v40 }
 0x16e   :  { %v3795_v30 = vpop.f32.mrf.mxu0  ;;  %1616 = vmatprep.mubr.f32.mxu1 %v1321_v47 }
 0x170   :  { %v3803_v31 = vpop.f32.mrf.mxu0 }
 0x171   :  { %1617 = vmatmul.mubr.f32.gmra.mxu1 %v1320_v43 }
 0x172   :  { %v3805_v34 = vpop.f32.mrf.mxu0  ;;  %1622 = vmatprep.mubr.f32.mxu1 %v1323_v36 }
 0x174   :  { %v1001_v63 = vpop.f32.mrf.mxu0 }
 0x175   :  { %1623 = vmatmul.mubr.f32.gmra.mxu1 %v1322_v33 }
 0x176   :  { %v1005_v19 = vpop.f32.mrf.mxu0  ;;  %1628 = vmatprep.mubr.f32.mxu1 %v1325_v46 }
 0x177   :  { %v1006_v33 = vadd.f32 %v1005_v19, %v385_v13 }
 0x178   :  { %v1007_v51 = vpop.f32.mrf.mxu0 }
 0x179   :  { %1629 = vmatmul.mubr.f32.gmra.mxu1 %v1324_v17  ;;  %v1008_v43 = vadd.f32 %v1007_v51, %v385_v13  ;;  %v1002_v17 = vadd.f32 %v1001_v63, %v380_v25  ;;  %v1337_v51 = vld [vmem:[%s4688_s3 + $0xa8] sm:$0xff]  ;;  %v994_v63 = vadd.f32 %v3795_v30, %v375_v59 }
 0x17a   :  { %v1011_v44 = vpop.f32.mrf.mxu0  ;;  %1634 = vmatprep.mubr.f32.mxu1 %v1327_v15 }
 0x17b   :  { %v1012_v12 = vadd.f32 %v1011_v44, %v390_v10  ;;  %v1000_v44 = vadd.f32 %v3805_v34, %v380_v25  ;;  %v1213_v13 = vmax.f32 %v1008_v43, 0.0  ;;  %v1336_v34 = vld [vmem:[%s4688_s3 + $0xa0] sm:$0xff]  ;;  %v1211_v25 = vmax.f32 %v1002_v17, 0.0 }
 0x17c   :  { %v1013_v11 = vpop.f32.mrf.mxu0 }
 0x17d   :  { %1635 = vmatmul.mubr.f32.gmra.mxu1 %v1326_v8  ;;  %v1014_v48 = vadd.f32 %v1013_v11, %v390_v10  ;;  %v360_v10 = vpop.permute.xlu0 %359  ;;  %v1214_v19 = vmax.f32 %v1012_v12, 0.0  ;;  %v355_v11 = vpop.permute.xlu1 %354  ;;  %v1210_v30 = vmax.f32 %v1000_v44, 0.0 }
 0x17e   :  { %v1017_v1 = vpop.f32.mrf.mxu0  ;;  %1640 = vmatprep.mubr.f32.mxu1 %v1329_v45  ;;  %v996_v45 = vadd.f32 %v3803_v31, %v375_v59  ;;  %v1339_v31 = vld [vmem:[%s4688_s3 + $0xb8] sm:$0xff] }
 0x17f   :  { %v1018_v20 = vadd.f32 %v1017_v1, %v395_v35  ;;  %v1215_v15 = vmax.f32 %v1014_v48, 0.0  ;;  %v1212_v1 = vmax.f32 %v1006_v33, 0.0  ;;  %v972_v48 = vadd.f32 %v3767_v41, %v355_v11  ;;  %v1343_v41 = vld [vmem:[%s4688_s3 + $0xd8] sm:$0xff] }
 0x180   :  { %v1019_v18 = vpop.f32.mrf.mxu0 }
 0x181   :  { %1641 = vmatmul.mubr.f32.gmra.mxu1 %v1328_v61  ;;  %v1020_v38 = vadd.f32 %v1019_v18, %v395_v35  ;;  %v1216_v46 = vmax.f32 %v1018_v20, 0.0  ;;  %v1334_v35 = vld [vmem:[%s4688_s3 + $0x90] sm:$0xff]  ;;  %v988_v18 = vadd.f32 %v3785_v16, %v370_v42 }
 0x182   :  { %v1023_v9 = vpop.f32.mrf.mxu0  ;;  %1646 = vmatprep.mubr.f32.mxu1 %v1331_v62  ;;  %v990_v62 = vadd.f32 %v3793_v14, %v370_v42  ;;  %v982_v14 = vadd.f32 %v3775_v0, %v365_v32  ;;  %v1338_v16 = vld [vmem:[%s4688_s3 + $0xb0] sm:$0xff]  ;;  %v345_v42 = vpop.permute.xlu1 %344  ;;  %v976_v0 = vadd.f32 %v3771_v21, %v360_v10  ;;  %v1340_v21 = vld [vmem:[%s4688_s3 + $0xc0] sm:$0xff] }
 0x183   :  { %v1024_v27 = vadd.f32 %v1023_v9, %v400_v23  ;;  %v1217_v36 = vmax.f32 %v1020_v38, 0.0  ;;  %v984_v9 = vadd.f32 %v3783_v26, %v365_v32  ;;  %v978_v38 = vadd.f32 %v3773_v22, %v360_v10  ;;  %v1341_v26 = vld [vmem:[%s4688_s3 + $0xc8] sm:$0xff] }
 0x184   :  { %v1025_v52 = vpop.f32.mrf.mxu0  ;;  %v1206_v20 = vmax.f32 %v988_v18, 0.0  ;;  %v970_v22 = vadd.f32 %v3761_v55, %v355_v11 }
 0x185   :  { %v1026_v50 = vadd.f32 %v1025_v52, %v400_v23  ;;  %1647 = vmatmul.mubr.f32.gmra.mxu1 %v1330_v56  ;;  %v1218_v40 = vmax.f32 %v1024_v27, 0.0  ;;  %v1209_v56 = vmax.f32 %v996_v45, 0.0  ;;  %v1208_v27 = vmax.f32 %v994_v63, 0.0 }
 0x186   :  { %v3837_v58 = vpop.f32.mrf.mxu0  ;;  %1652 = vmatprep.mubr.f32.mxu1 %v1333_v7  ;;  %v350_v7 = vpop.permute.xlu0 %349 }
 0x187   :  { %v1219_v6 = vmax.f32 %v1026_v50, 0.0  ;;  %v1207_v50 = vmax.f32 %v990_v62, 0.0  ;;  %v966_v12 = vadd.f32 %v3755_v3, %v350_v7  ;;  %v964_v55 = vadd.f32 %v3749_v5, %v350_v7  ;;  %v335_v17 = vpop.permute.xlu1 %334  ;;  %v1342_v5 = vld [vmem:[%s4688_s3 + $0xd0] sm:$0xff] }
 0x188   :  { %v3845_v47 = vpop.f32.mrf.mxu0  ;;  %v958_v3 = vadd.f32 %v3737_v28, %v345_v42 }
 0x189   :  { %1653 = vmatmul.mubr.f32.gmra.mxu1 %v1332_v29  ;;  %2086 = vmatprep.subr.mxu1 %v1219_v6  ;;  %v1205_v6 = vmax.f32 %v984_v9, 0.0  ;;  %v1199_v44 = vmax.f32 %v966_v12, 0.0  ;;  %v1198_v28 = vmax.f32 %v964_v55, 0.0  ;;  %v1352_v12 = vld [vmem:[%s4688_s3 + $0x120] sm:$0xff]  ;;  %v1354_v55 = vld [vmem:[%s4688_s3 + $0x130] sm:$0xff] }
 0x18a   :  { %v3847_v23 = vpop.f32.mrf.mxu0  ;;  %2087 = vmatpush1.msra.mxu1 %v1218_v40  ;;  %1658 = vmatprep.mubr.f32.mxu1 %v1335_v60  ;;  %v1204_v60 = vmax.f32 %v982_v14, 0.0  ;;  %v1203_v40 = vmax.f32 %v978_v38, 0.0  ;;  %v340_v43 = vpop.permute.xlu0 %339 }
 0x18b   :  { %2088 = vmatprep.subr.mxu1 %v1217_v36  ;;  %v1202_v36 = vmax.f32 %v976_v0, 0.0  ;;  %v954_v10 = vadd.f32 %v3731_v37, %v340_v43  ;;  %v946_v37 = vadd.f32 %v3717_v53, %v335_v17  ;;  %v1351_v0 = vld [vmem:[%s4688_s3 + $0x118] sm:$0xff] }
 0x18c   :  { %v3856_v8 = vpop.f32.mrf.mxu0  ;;  %2089 = vmatpush1.msra.mxu1 %v1216_v46  ;;  %v960_v46 = vadd.f32 %v3743_v57, %v345_v42  ;;  %v1345_v57 = vld [vmem:[%s4688_s3 + $0xe8] sm:$0xff]  ;;  %v1348_v42 = vld [vmem:[%s4688_s3 + $0x100] sm:$0xff] }
 0x18d   :  { %1659 = vmatmul.mubr.f32.gmra.mxu1 %v1334_v35  ;;  %2090 = vmatprep.subr.mxu1 %v1215_v15  ;;  %v1201_v35 = vmax.f32 %v972_v48, 0.0  ;;  %v1200_v15 = vmax.f32 %v970_v22, 0.0  ;;  %v1192_v7 = vmax.f32 %v946_v37, 0.0  ;;  %v1353_v22 = vld [vmem:[%s4688_s3 + $0x128] sm:$0xff]  ;;  %v1360_v37 = vld [vmem:[%s4688_s3 + $0x160] sm:$0xff] }
 0x18e   :  { %v3860_v61 = vpop.f32.mrf.mxu0  ;;  %2091 = vmatpush1.msra.mxu1 %v1214_v19  ;;  %1664 = vmatprep.mubr.f32.mxu1 %v1337_v51  ;;  %v952_v19 = vadd.f32 %v3725_v54, %v340_v43  ;;  %v1197_v11 = vmax.f32 %v960_v46, 0.0  ;;  %v330_v63 = vpop.permute.xlu0 %329  ;;  %v1344_v54 = vld [vmem:[%s4688_s3 + $0xe0] sm:$0xff] }
 0x18f   :  { %2092 = vmatprep.subr.mxu1 %v1213_v13  ;;  %v948_v13 = vadd.f32 %v3721_v2, %v335_v17  ;;  %v942_v62 = vadd.f32 %v3713_v49, %v330_v63  ;;  %v1347_v2 = vld [vmem:[%s4688_s3 + $0xf8] sm:$0xff]  ;;  %v940_v53 = vadd.f32 %v3709_v4, %v330_v63  ;;  %v1346_v4 = vld [vmem:[%s4688_s3 + $0xf0] sm:$0xff] }
 0x190   :  { %v3870_v59 = vpop.f32.mrf.mxu0  ;;  %2093 = vmatpush1.msra.mxu1 %v1212_v1  ;;  %v1196_v1 = vmax.f32 %v958_v3, 0.0  ;;  %v1194_v18 = vmax.f32 %v952_v19, 0.0  ;;  %v1358_v19 = vld [vmem:[%s4688_s3 + $0x150] sm:$0xff] }
 0x191   :  { %1665 = vmatmul.mubr.f32.gmra.mxu1 %v1336_v34  ;;  %2094 = vmatprep.subr.mxu1 %v1211_v25  ;;  %v1195_v25 = vmax.f32 %v954_v10, 0.0 }
 0x192   :  { %v3874_v52 = vpop.f32.mrf.mxu0  ;;  %2095 = vmatpush1.msra.mxu1 %v1210_v30  ;;  %1670 = vmatprep.mubr.f32.mxu1 %v1339_v31  ;;  %v325_v31 = vpop.permute.xlu1 %324 }
 0x193   :  { %2096 = vmatprep.subr.mxu1 %v1209_v56  ;;  %v936_v9 = vadd.f32 %v3705_v39, %v325_v31  ;;  %v1193_v56 = vmax.f32 %v948_v13, 0.0  ;;  %v934_v49 = vadd.f32 %v3701_v24, %v325_v31  ;;  %v1349_v39 = vld [vmem:[%s4688_s3 + $0x108] sm:$0xff]  ;;  %v480_v46 = vpop.permute.xlu0 %479  ;;  %v1362_v31 = vld [vmem:[%s4688_s3 + $0x170] sm:$0xff] }
 0x194   :  { %v3884_v29 = vpop.f32.mrf.mxu0  ;;  %2097 = vmatpush1.msra.mxu1 %v1208_v27  ;;  %v1191_v27 = vmax.f32 %v942_v62, 0.0 }
 0x195   :  { %1671 = vmatmul.mubr.f32.gmra.mxu1 %v1338_v16  ;;  %2098 = vmatprep.subr.mxu1 %v1207_v50  ;;  %v1190_v16 = vmax.f32 %v940_v53, 0.0  ;;  %v1189_v24 = vmax.f32 %v936_v9, 0.0  ;;  %v1188_v50 = vmax.f32 %v934_v49, 0.0  ;;  %v1365_v53 = vld [vmem:[%s4688_s3 + $0x188] sm:$0xff] }
 0x196   :  { %v3888_v32 = vpop.f32.mrf.mxu0  ;;  %2099 = vmatpush1.msra.mxu1 %v1206_v20  ;;  %1676 = vmatprep.mubr.f32.mxu1 %v1341_v26  ;;  %v475_v17 = vpop.permute.xlu1 %474 }
 0x197   :  { %2100 = vmatprep.subr.mxu1 %v1205_v6  ;;  %v1350_v6 = vld [vmem:[%s4688_s3 + $0x110] sm:$0xff] }
 0x198   :  { %v3898_v33 = vpop.f32.mrf.mxu0  ;;  %2101 = vmatpush1.msra.mxu1 %v1204_v60 }
 0x199   :  { %1677 = vmatmul.mubr.f32.gmra.mxu1 %v1340_v21  ;;  %2102 = vmatprep.subr.mxu1 %v1203_v40  ;;  %v1355_v40 = vld [vmem:[%s4688_s3 + $0x138] sm:$0xff] }
 0x19a   :  { %v3902_v51 = vpop.f32.mrf.mxu0  ;;  %2103 = vmatpush1.msra.mxu1 %v1202_v36  ;;  %1682 = vmatprep.mubr.f32.mxu1 %v1343_v41  ;;  %v1357_v36 = vld [vmem:[%s4688_s3 + $0x148] sm:$0xff]  ;;  %v465_v13 = vpop.permute.xlu1 %464 }
 0x19b   :  { %2104 = vmatprep.subr.mxu1 %v1201_v35 }
 0x19c   :  { %v3912_v45 = vpop.f32.mrf.mxu0  ;;  %2105 = vmatpush1.msra.mxu1 %v1200_v15  ;;  %v1356_v15 = vld [vmem:[%s4688_s3 + $0x140] sm:$0xff] }
 0x19d   :  { %1683 = vmatmul.mubr.f32.gmra.mxu1 %v1342_v5  ;;  %2106 = vmatprep.subr.mxu1 %v1199_v44  ;;  %v1359_v5 = vld [vmem:[%s4688_s3 + $0x158] sm:$0xff]  ;;  %v470_v44 = vpop.permute.xlu0 %469 }
 0x19e   :  { %v3916_v34 = vpop.f32.mrf.mxu0  ;;  %2107 = vmatpush1.msra.mxu1 %v1198_v28  ;;  %1688 = vmatprep.mubr.f32.mxu1 %v1345_v57  ;;  %v1361_v28 = vld [vmem:[%s4688_s3 + $0x168] sm:$0xff] }
 0x19f   :  { %2108 = vmatprep.subr.mxu1 %v1197_v11 }
 0x1a0   :  { %v3926_v30 = vpop.f32.mrf.mxu0  ;;  %2109 = vmatpush1.msra.mxu1 %v1196_v1  ;;  %v1363_v1 = vld [vmem:[%s4688_s3 + $0x178] sm:$0xff] }
 0x1a1   :  { %1689 = vmatmul.mubr.f32.gmra.mxu1 %v1344_v54  ;;  %2110 = vmatprep.subr.mxu1 %v1195_v25  ;;  %v460_v54 = vpop.permute.xlu0 %459  ;;  %v455_v25 = vpop.permute.xlu1 %454 }
 0x1a2   :  { %v3930_v14 = vpop.f32.mrf.mxu0  ;;  %2111 = vmatpush1.msra.mxu1 %v1194_v18  ;;  %1694 = vmatprep.mubr.f32.mxu1 %v1347_v2 }
 0x1a3   :  { %2112 = vmatprep.subr.mxu1 %v1193_v56 }
 0x1a4   :  { %v3938_v38 = vpop.f32.mrf.mxu0  ;;  %2113 = vmatpush1.msra.mxu1 %v1192_v7 }
 0x1a5   :  { %1695 = vmatmul.mubr.f32.gmra.mxu1 %v1346_v4  ;;  %2114 = vmatprep.subr.mxu1 %v1191_v27  ;;  %v450_v7 = vpop.permute.xlu0 %449  ;;  %v1364_v27 = vld [vmem:[%s4688_s3 + $0x180] sm:$0xff] }
 0x1a6   :  { %v3940_v26 = vpop.f32.mrf.mxu0  ;;  %2115 = vmatpush1.msra.mxu1 %v1190_v16  ;;  %1700 = vmatprep.mubr.f32.mxu1 %v1349_v39 }
 0x1a7   :  { %2116 = vmatprep.subr.mxu1 %v1189_v24  ;;  %v1367_v24 = vld [vmem:[%s4688_s3 + $0x198] sm:$0xff] }
 0x1a8   :  { %v3948_v20 = vpop.f32.mrf.mxu0  ;;  %2117 = vmatpush1.msra.mxu1 %v1188_v50  ;;  %v445_v50 = vpop.permute.xlu1 %444 }
 0x1a9   :  { %1701 = vmatmul.mubr.f32.gmra.mxu1 %v1348_v42 }
 0x1aa   :  { %v3950_v48 = vpop.f32.mrf.mxu0  ;;  %1706 = vmatprep.mubr.f32.mxu1 %v1351_v0 }
 0x1ac   :  { %v3958_v60 = vpop.f32.mrf.mxu0 }
 0x1ad   :  { %1707 = vmatmul.mubr.f32.gmra.mxu1 %v1350_v6 }
 0x1ae   :  { %v3960_v21 = vpop.f32.mrf.mxu0  ;;  %1712 = vmatprep.mubr.f32.mxu1 %v1353_v22 }
 0x1b0   :  { %v3968_v41 = vpop.f32.mrf.mxu0 }
 0x1b1   :  { %1713 = vmatmul.mubr.f32.gmra.mxu1 %v1352_v12 }
 0x1b2   :  { %v3970_v43 = vpop.f32.mrf.mxu0  ;;  %1718 = vmatprep.mubr.f32.mxu1 %v1355_v40 }
 0x1b4   :  { %v1097_v35 = vpop.f32.mrf.mxu0 }
 0x1b5   :  { %1719 = vmatmul.mubr.f32.gmra.mxu1 %v1354_v55  ;;  %v1366_v55 = vld [vmem:[%s4688_s3 + $0x190] sm:$0xff] }
 0x1b6   :  { %v1101_v3 = vpop.f32.mrf.mxu0  ;;  %1724 = vmatprep.mubr.f32.mxu1 %v1357_v36  ;;  %v1098_v36 = vadd.f32 %v1097_v35, %v460_v54 }
 0x1b7   :  { %v1102_v12 = vadd.f32 %v1101_v3, %v465_v13  ;;  %v1092_v3 = vadd.f32 %v3968_v41, %v455_v25  ;;  %v1371_v41 = vld [vmem:[%s4688_s3 + $0x1b8] sm:$0xff] }
 0x1b8   :  { %v1103_v10 = vpop.f32.mrf.mxu0 }
 0x1b9   :  { %1725 = vmatmul.mubr.f32.gmra.mxu1 %v1356_v15  ;;  %v1104_v6 = vadd.f32 %v1103_v10, %v465_v13  ;;  %v440_v15 = vpop.permute.xlu0 %439  ;;  %v1244_v35 = vmax.f32 %v1102_v12, 0.0  ;;  %v1086_v13 = vadd.f32 %v3958_v60, %v450_v7  ;;  %v1370_v60 = vld [vmem:[%s4688_s3 + $0x1b0] sm:$0xff] }
 0x1ba   :  { %v1107_v57 = vpop.f32.mrf.mxu0  ;;  %1730 = vmatprep.mubr.f32.mxu1 %v1359_v5  ;;  %v1096_v5 = vadd.f32 %v3970_v43, %v460_v54  ;;  %v1243_v43 = vmax.f32 %v1098_v36, 0.0  ;;  %v1078_v54 = vadd.f32 %v3940_v26, %v445_v50 }
 0x1bb   :  { %v1108_v42 = vadd.f32 %v1107_v57, %v470_v44  ;;  %v435_v57 = vpop.permute.xlu1 %434 }
 0x1bc   :  { %v1109_v11 = vpop.f32.mrf.mxu0  ;;  %v1068_v26 = vadd.f32 %v3926_v30, %v435_v57  ;;  %v1375_v30 = vld [vmem:[%s4688_s3 + $0x1d8] sm:$0xff] }
 0x1bd   :  { %1731 = vmatmul.mubr.f32.gmra.mxu1 %v1358_v19  ;;  %v1110_v39 = vadd.f32 %v1109_v11, %v470_v44  ;;  %v1246_v10 = vmax.f32 %v1108_v42, 0.0  ;;  %v1245_v44 = vmax.f32 %v1104_v6, 0.0  ;;  %v1090_v19 = vadd.f32 %v3960_v21, %v455_v25 }
 0x1be   :  { %v1113_v63 = vpop.f32.mrf.mxu0  ;;  %1736 = vmatprep.mubr.f32.mxu1 %v1361_v28  ;;  %v1368_v28 = vld [vmem:[%s4688_s3 + $0x1a0] sm:$0xff]  ;;  %v1084_v11 = vadd.f32 %v3950_v48, %v450_v7  ;;  %v1080_v21 = vadd.f32 %v3948_v20, %v445_v50  ;;  %v1074_v25 = vadd.f32 %v3938_v38, %v440_v15  ;;  %v1239_v48 = vmax.f32 %v1086_v13, 0.0  ;;  %v1373_v20 = vld [vmem:[%s4688_s3 + $0x1c8] sm:$0xff]  ;;  %v1374_v50 = vld [vmem:[%s4688_s3 + $0x1d0] sm:$0xff] }
 0x1bf   :  { %v1114_v4 = vadd.f32 %v1113_v63, %v475_v17  ;;  %v1242_v63 = vmax.f32 %v1096_v5, 0.0  ;;  %v1372_v38 = vld [vmem:[%s4688_s3 + $0x1c0] sm:$0xff]  ;;  %v2646_v13 = vld [vmem:[%s4688_s3 + $0x228] sm:$0xff] }
 0x1c0   :  { %v1115_v62 = vpop.f32.mrf.mxu0  ;;  %v1235_v7 = vmax.f32 %v1074_v25, 0.0  ;;  %v2655_v25 = vld [vmem:[%s4688_s3 + $0x270] sm:$0xff] }
 0x1c1   :  { %1737 = vmatmul.mubr.f32.gmra.mxu1 %v1360_v37  ;;  %v1116_v56 = vadd.f32 %v1115_v62, %v475_v17  ;;  %v1248_v40 = vmax.f32 %v1114_v4, 0.0  ;;  %v1369_v17 = vld [vmem:[%s4688_s3 + $0x1a8] sm:$0xff]  ;;  %v1241_v37 = vmax.f32 %v1092_v3, 0.0  ;;  %v1240_v62 = vmax.f32 %v1090_v19, 0.0 }
 0x1c2   :  { %v1119_v2 = vpop.f32.mrf.mxu0  ;;  %1742 = vmatprep.mubr.f32.mxu1 %v1363_v1  ;;  %v430_v1 = vpop.permute.xlu0 %429 }
 0x1c3   :  { %v1120_v18 = vadd.f32 %v1119_v2, %v480_v46  ;;  %v1249_v22 = vmax.f32 %v1116_v56, 0.0  ;;  %v425_v2 = vpop.permute.xlu1 %424  ;;  %v1236_v56 = vmax.f32 %v1078_v54, 0.0  ;;  %v1060_v4 = vadd.f32 %v3902_v51, %v430_v1  ;;  %v2654_v54 = vld [vmem:[%s4688_s3 + $0x268] sm:$0xff] }
 0x1c4   :  { %v1121_v9 = vpop.f32.mrf.mxu0 }
 0x1c5   :  { %v1122_v49 = vadd.f32 %v1121_v9, %v480_v46  ;;  %1743 = vmatmul.mubr.f32.gmra.mxu1 %v1362_v31  ;;  %v1250_v0 = vmax.f32 %v1120_v18, 0.0  ;;  %v1247_v46 = vmax.f32 %v1110_v39, 0.0  ;;  %v1072_v31 = vadd.f32 %v3930_v14, %v440_v15 }
 0x1c6   :  { %1748 = vmatprep.mubr.f32.mxu1 %v1365_v53  ;;  %v1238_v53 = vmax.f32 %v1084_v11, 0.0  ;;  %v1237_v18 = vmax.f32 %v1080_v21, 0.0  ;;  %v1066_v9 = vadd.f32 %v3916_v34, %v435_v57  ;;  %v420_v14 = vpop.permute.xlu0 %419  ;;  %v1056_v34 = vadd.f32 %v3898_v33, %v425_v2  ;;  %v1377_v33 = vld [vmem:[%s4688_s3 + $0x1e8] sm:$0xff]  ;;  %v2647_v11 = vld [vmem:[%s4688_s3 + $0x230] sm:$0xff]  ;;  %v2649_v21 = vld [vmem:[%s4688_s3 + $0x240] sm:$0xff] }
 0x1c7   :  { %v1251_v16 = vmax.f32 %v1122_v49, 0.0  ;;  %v1062_v49 = vadd.f32 %v3912_v45, %v430_v1  ;;  %v1233_v39 = vmax.f32 %v1068_v26, 0.0  ;;  %v1050_v42 = vadd.f32 %v3884_v29, %v420_v14  ;;  %v1376_v29 = vld [vmem:[%s4688_s3 + $0x1e0] sm:$0xff]  ;;  %v2651_v1 = vld [vmem:[%s4688_s3 + $0x250] sm:$0xff]  ;;  %v2662_v26 = vld [vmem:[%s4688_s3 + $0x2a8] sm:$0xff] }
 0x1c8   :  { %v1232_v45 = vmax.f32 %v1066_v9, 0.0  ;;  %v1230_v6 = vmax.f32 %v1060_v4, 0.0  ;;  %v2667_v4 = vld [vmem:[%s4688_s3 + $0x2d0] sm:$0xff] }
 0x1c9   :  { %1749 = vmatmul.mubr.f32.gmra.mxu1 %v1364_v27  ;;  %2118 = vmatprep.subr.mxu1 %v1251_v16  ;;  %v1234_v27 = vmax.f32 %v1072_v31, 0.0  ;;  %v415_v16 = vpop.permute.xlu1 %414  ;;  %v1231_v51 = vmax.f32 %v1062_v49, 0.0  ;;  %v2666_v49 = vld [vmem:[%s4688_s3 + $0x2c8] sm:$0xff] }
 0x1ca   :  { %2119 = vmatpush2.msra.mxu1 %v1250_v0  ;;  %1754 = vmatprep.mubr.f32.mxu1 %v1367_v24  ;;  %v1054_v24 = vadd.f32 %v3888_v32, %v425_v2  ;;  %v1048_v0 = vadd.f32 %v3874_v52, %v420_v14  ;;  %v1044_v32 = vadd.f32 %v3870_v59, %v415_v16  ;;  %v410_v12 = vpop.permute.xlu0 %409  ;;  %v1227_v52 = vmax.f32 %v1050_v42, 0.0  ;;  %v1379_v59 = vld [vmem:[%s4688_s3 + $0x1f8] sm:$0xff]  ;;  %v2673_v42 = vld [vmem:[%s4688_s3 + $0x300] sm:$0xff] }
 0x1cb   :  { %2120 = vmatprep.subr.mxu1 %v1249_v22  ;;  %v1229_v22 = vmax.f32 %v1056_v34, 0.0  ;;  %v1038_v36 = vadd.f32 %v3856_v8, %v410_v12  ;;  %v1378_v8 = vld [vmem:[%s4688_s3 + $0x1f0] sm:$0xff]  ;;  %v2660_v2 = vld [vmem:[%s4688_s3 + $0x298] sm:$0xff]  ;;  %v2670_v34 = vld [vmem:[%s4688_s3 + $0x2e8] sm:$0xff] }
 0x1cc   :  { %2121 = vmatpush2.msra.mxu1 %v1248_v40  ;;  %v1042_v40 = vadd.f32 %v3860_v61, %v415_v16  ;;  %v1226_v15 = vmax.f32 %v1048_v0, 0.0  ;;  %v1225_v5 = vmax.f32 %v1044_v32, 0.0  ;;  %v2668_v14 = vld [vmem:[%s4688_s3 + $0x2d8] sm:$0xff] }
 0x1cd   :  { %1755 = vmatmul.mubr.f32.gmra.mxu1 %v1366_v55  ;;  %2122 = vmatprep.subr.mxu1 %v1247_v46  ;;  %v1228_v55 = vmax.f32 %v1054_v24, 0.0  ;;  %v405_v46 = vpop.permute.xlu1 %404  ;;  %v2672_v16 = vld [vmem:[%s4688_s3 + $0x2f8] sm:$0xff] }
 0x1ce   :  { %2123 = vmatpush2.msra.mxu1 %v1246_v10  ;;  %1760 = vmatprep.mubr.f32.mxu1 %v1369_v17  ;;  %v1036_v17 = vadd.f32 %v3847_v23, %v410_v12  ;;  %v1032_v61 = vadd.f32 %v3845_v47, %v405_v46  ;;  %v1030_v10 = vadd.f32 %v3837_v58, %v405_v46  ;;  %v1224_v3 = vmax.f32 %v1042_v40, 0.0  ;;  %v2642_v23 = vld [vmem:[%s4688_s3 + $0x208] sm:$0xff]  ;;  %v2641_v58 = vld [vmem:[%s4688_s3 + $0x200] sm:$0xff]  ;;  %v4127_v31 = vpop.permute.xlu0 %1457 }
 0x1cf   :  { %2124 = vmatprep.subr.mxu1 %v1245_v44  ;;  %v1223_v44 = vmax.f32 %v1038_v36, 0.0  ;;  %v2680_v36 = vld [vmem:[%s4688_s3 + $0x338] sm:$0xff] }
 0x1d0   :  { %2125 = vmatpush2.msra.mxu1 %v1244_v35  ;;  %v1222_v57 = vmax.f32 %v1036_v17, 0.0  ;;  %v1221_v47 = vmax.f32 %v1032_v61, 0.0  ;;  %v1220_v19 = vmax.f32 %v1030_v10, 0.0  ;;  %v2644_v35 = vld [vmem:[%s4688_s3 + $0x218] sm:$0xff] }
 0x1d1   :  { %1761 = vmatmul.mubr.f32.gmra.mxu1 %v1368_v28  ;;  %2126 = vmatprep.subr.mxu1 %v1243_v43  ;;  %v2643_v28 = vld [vmem:[%s4688_s3 + $0x210] sm:$0xff]  ;;  %v2645_v43 = vld [vmem:[%s4688_s3 + $0x220] sm:$0xff] }
 0x1d2   :  { %2127 = vmatpush2.msra.mxu1 %v1242_v63  ;;  %1766 = vmatprep.mubr.f32.mxu1 %v1371_v41  ;;  %v2648_v41 = vld [vmem:[%s4688_s3 + $0x238] sm:$0xff]  ;;  %v2650_v63 = vld [vmem:[%s4688_s3 + $0x248] sm:$0xff]  ;;  %v4138_v9 = vpop.permute.xlu0 %1452 }
 0x1d3   :  { %2128 = vmatprep.subr.mxu1 %v1241_v37  ;;  %v2652_v37 = vld [vmem:[%s4688_s3 + $0x258] sm:$0xff] }
 0x1d4   :  { %2129 = vmatpush2.msra.mxu1 %v1240_v62  ;;  %v2653_v62 = vld [vmem:[%s4688_s3 + $0x260] sm:$0xff] }
 0x1d5   :  { %1767 = vmatmul.mubr.f32.gmra.mxu1 %v1370_v60  ;;  %2130 = vmatprep.subr.mxu1 %v1239_v48  ;;  %v2656_v60 = vld [vmem:[%s4688_s3 + $0x278] sm:$0xff]  ;;  %v2658_v48 = vld [vmem:[%s4688_s3 + $0x288] sm:$0xff] }
 0x1d6   :  { %2131 = vmatpush2.msra.mxu1 %v1238_v53  ;;  %1772 = vmatprep.mubr.f32.mxu1 %v1373_v20  ;;  %v2657_v20 = vld [vmem:[%s4688_s3 + $0x280] sm:$0xff]  ;;  %v2659_v53 = vld [vmem:[%s4688_s3 + $0x290] sm:$0xff] }
 0x1d7   :  { %2132 = vmatprep.subr.mxu1 %v1237_v18  ;;  %v2661_v18 = vld [vmem:[%s4688_s3 + $0x2a0] sm:$0xff] }
 0x1d8   :  { %2133 = vmatpush2.msra.mxu1 %v1236_v56  ;;  %v2664_v56 = vld [vmem:[%s4688_s3 + $0x2b8] sm:$0xff] }
 0x1d9   :  { %1773 = vmatmul.mubr.f32.gmra.mxu1 %v1372_v38  ;;  %2134 = vmatprep.subr.mxu1 %v1235_v7  ;;  %v2663_v38 = vld [vmem:[%s4688_s3 + $0x2b0] sm:$0xff]  ;;  %v4149_v7 = vpop.permute.xlu0 %1447 }
 0x1da   :  { %2135 = vmatpush2.msra.mxu1 %v1234_v27  ;;  %1778 = vmatprep.mubr.f32.mxu1 %v1375_v30  ;;  %v2665_v30 = vld [vmem:[%s4688_s3 + $0x2c0] sm:$0xff] }
 0x1db   :  { %2136 = vmatprep.subr.mxu1 %v1233_v39  ;;  %v2669_v39 = vld [vmem:[%s4688_s3 + $0x2e0] sm:$0xff] }
 0x1dc   :  { %2137 = vmatpush2.msra.mxu1 %v1232_v45  ;;  %v2671_v45 = vld [vmem:[%s4688_s3 + $0x2f0] sm:$0xff] }
 0x1dd   :  { %1779 = vmatmul.mubr.f32.gmra.mxu1 %v1374_v50  ;;  %2138 = vmatprep.subr.mxu1 %v1231_v51  ;;  %v4160_v27 = vpop.permute.xlu0 %1442  ;;  %v2674_v50 = vld [vmem:[%s4688_s3 + $0x308] sm:$0xff] }
 0x1de   :  { %2139 = vmatpush2.msra.mxu1 %v1230_v6  ;;  %1784 = vmatprep.mubr.f32.mxu1 %v1377_v33  ;;  %v2676_v33 = vld [vmem:[%s4688_s3 + $0x318] sm:$0xff]  ;;  %v2675_v6 = vld [vmem:[%s4688_s3 + $0x310] sm:$0xff] }
 0x1df   :  { %2140 = vmatprep.subr.mxu1 %v1229_v22  ;;  %v2678_v22 = vld [vmem:[%s4688_s3 + $0x328] sm:$0xff] }
 0x1e0   :  { %2141 = vmatpush2.msra.mxu1 %v1228_v55  ;;  %v2677_v55 = vld [vmem:[%s4688_s3 + $0x320] sm:$0xff] }
 0x1e1   :  { %1785 = vmatmul.mubr.f32.gmra.mxu1 %v1376_v29  ;;  %2142 = vmatprep.subr.mxu1 %v1227_v52  ;;  %v4171_v24 = vpop.permute.xlu0 %1437 }
 0x1e2   :  { %2143 = vmatpush2.msra.mxu1 %v1226_v15  ;;  %1790 = vmatprep.mubr.f32.mxu1 %v1379_v59  ;;  %v2679_v59 = vld [vmem:[%s4688_s3 + $0x330] sm:$0xff]  ;;  %v2682_v15 = vld [vmem:[%s4688_s3 + $0x348] sm:$0xff] }
 0x1e3   :  { %2144 = vmatprep.subr.mxu1 %v1225_v5  ;;  %v2681_v5 = vld [vmem:[%s4688_s3 + $0x340] sm:$0xff] }
 0x1e4   :  { %2145 = vmatpush2.msra.mxu1 %v1224_v3  ;;  %v2684_v3 = vld [vmem:[%s4688_s3 + $0x358] sm:$0xff] }
 0x1e5   :  { %1791 = vmatmul.mubr.f32.gmra.mxu1 %v1378_v8  ;;  %2146 = vmatprep.subr.mxu1 %v1223_v44  ;;  %v4182_v51 = vpop.permute.xlu0 %1432 }
 0x1e6   :  { %2147 = vmatpush2.msra.mxu1 %v1222_v57  ;;  %2150 = vmatprep.mubr.f32.mxu1 %v2642_v23  ;;  %v2683_v23 = vld [vmem:[%s4688_s3 + $0x350] sm:$0xff] }
 0x1e7   :  { %2148 = vmatprep.subr.mxu1 %v1221_v47  ;;  %v2686_v47 = vld [vmem:[%s4688_s3 + $0x368] sm:$0xff] }
 0x1e8   :  { %2149 = vmatpush2.msra.mxu1 %v1220_v19 }
 0x1e9   :  { %2151 = vmatmul.mubr.f32.vlgmr.msra.gmra.mxu1 %v2641_v58  ;;  %v4197_v12 = vpop.permute.xlu0 %1427  ;;  %v2685_v58 = vld [vmem:[%s4688_s3 + $0x360] sm:$0xff] }
 0x1ea   :  { %2156 = vmatprep.mubr.f32.mxu1 %v2644_v35 }
 0x1ed   :  { %2157 = vmatmul.mubr.f32.gmra.mxu1 %v2643_v28  ;;  %v4214_v46 = vpop.permute.xlu0 %1422 }
 0x1ee   :  { %2162 = vmatprep.mubr.f32.mxu1 %v2646_v13  ;;  %v2688_v13 = vld [vmem:[%s4688_s3 + $0x378] sm:$0xff] }
 0x1f1   :  { %2163 = vmatmul.mubr.f32.gmra.mxu1 %v2645_v43  ;;  %v4231_v8 = vpop.permute.xlu0 %1417 }
 0x1f2   :  { %2168 = vmatprep.mubr.f32.mxu1 %v2648_v41  ;;  %v2687_v41 = vld [vmem:[%s4688_s3 + $0x370] sm:$0xff] }
 0x1f5   :  { %2169 = vmatmul.mubr.f32.gmra.mxu1 %v2647_v11  ;;  %v4248_v35 = vpop.permute.xlu0 %1412 }
 0x1f6   :  { %2174 = vmatprep.mubr.f32.mxu1 %v2650_v63  ;;  %v2690_v63 = vld [vmem:[%s4688_s3 + $0x388] sm:$0xff] }
 0x1f9   :  { %2175 = vmatmul.mubr.f32.gmra.mxu1 %v2649_v21  ;;  %v4265_v21 = vpop.permute.xlu0 %1407 }
 0x1fa   :  { %2180 = vmatprep.mubr.f32.mxu1 %v2652_v37 }
 0x1fd   :  { %2181 = vmatmul.mubr.f32.gmra.mxu1 %v2651_v1  ;;  %v2689_v1 = vld [vmem:[%s4688_s3 + $0x380] sm:$0xff] }
 0x1fe   :  { %2186 = vmatprep.mubr.f32.mxu1 %v2654_v54 }
 0x201   :  { %2187 = vmatmul.mubr.f32.gmra.mxu1 %v2653_v62  ;;  %v2692_v62 = vld [vmem:[%s4688_s3 + $0x398] sm:$0xff] }
 0x202   :  { %2192 = vmatprep.mubr.f32.mxu1 %v2656_v60 }
 0x205   :  { %2193 = vmatmul.mubr.f32.gmra.mxu1 %v2655_v25  ;;  %v2691_v25 = vld [vmem:[%s4688_s3 + $0x390] sm:$0xff] }
 0x206   :  { %2198 = vmatprep.mubr.f32.mxu1 %v2658_v48  ;;  %v4282_v48 = vpop.permute.xlu0 %1402 }
 0x209   :  { %2199 = vmatmul.mubr.f32.gmra.mxu1 %v2657_v20 }
 0x20a   :  { %2204 = vmatprep.mubr.f32.mxu1 %v2660_v2  ;;  %v2694_v2 = vld [vmem:[%s4688_s3 + $0x3a8] sm:$0xff] }
 0x20d   :  { %2205 = vmatmul.mubr.f32.gmra.mxu1 %v2659_v53 }
 0x20e   :  { %2210 = vmatprep.mubr.f32.mxu1 %v2662_v26  ;;  %v2693_v26 = vld [vmem:[%s4688_s3 + $0x3a0] sm:$0xff] }
 0x211   :  { %2211 = vmatmul.mubr.f32.gmra.mxu1 %v2661_v18 }
 0x212   :  { %2216 = vmatprep.mubr.f32.mxu1 %v2664_v56  ;;  %v2696_v56 = vld [vmem:[%s4688_s3 + $0x3b8] sm:$0xff] }
 0x215   :  { %2217 = vmatmul.mubr.f32.gmra.mxu1 %v2663_v38  ;;  %v4299_v38 = vpop.permute.xlu0 %1397 }
 0x216   :  { %2222 = vmatprep.mubr.f32.mxu1 %v2666_v49 }
 0x219   :  { %2223 = vmatmul.mubr.f32.gmra.mxu1 %v2665_v30  ;;  %v2695_v30 = vld [vmem:[%s4688_s3 + $0x3b0] sm:$0xff] }
 0x21a   :  { %2228 = vmatprep.mubr.f32.mxu1 %v2668_v14 }
 0x21d   :  { %2229 = vmatmul.mubr.f32.gmra.mxu1 %v2667_v4  ;;  %v2698_v4 = vld [vmem:[%s4688_s3 + $0x3c8] sm:$0xff] }
 0x21e   :  { %2234 = vmatprep.mubr.f32.mxu1 %v2670_v34 }
 0x221   :  { %2235 = vmatmul.mubr.f32.gmra.mxu1 %v2669_v39  ;;  %v2697_v39 = vld [vmem:[%s4688_s3 + $0x3c0] sm:$0xff] }
 0x222   :  { %2240 = vmatprep.mubr.f32.mxu1 %v2672_v16  ;;  %v4312_v16 = vpop.permute.xlu0 %1392 }
 0x225   :  { %2241 = vmatmul.mubr.f32.gmra.mxu1 %v2671_v45 }
 0x226   :  { %2246 = vmatprep.mubr.f32.mxu1 %v2674_v50  ;;  %v2700_v50 = vld [vmem:[%s4688_s3 + $0x3d8] sm:$0xff] }
 0x229   :  { %v4187_v0 = vpop.f32.mrf.mxu1  ;;  %2247 = vmatmul.mubr.f32.gmra.mxu1 %v2673_v42 }
 0x22a   :  { %2252 = vmatprep.mubr.f32.mxu1 %v2676_v33  ;;  %v2699_v33 = vld [vmem:[%s4688_s3 + $0x3d0] sm:$0xff] }
 0x22b   :  { %v4192_v32 = vpop.f32.mrf.mxu1 }
 0x22d   :  { %v4199_v40 = vpop.f32.mrf.mxu1  ;;  %2253 = vmatmul.mubr.f32.gmra.mxu1 %v2675_v6 }
 0x22e   :  { %2258 = vmatprep.mubr.f32.mxu1 %v2678_v22  ;;  %v2702_v22 = vld [vmem:[%s4688_s3 + $0x3e8] sm:$0xff] }
 0x22f   :  { %v4204_v29 = vpop.f32.mrf.mxu1 }
 0x231   :  { %v4209_v52 = vpop.f32.mrf.mxu1  ;;  %2259 = vmatmul.mubr.f32.gmra.mxu1 %v2677_v55  ;;  %v4323_v55 = vpop.permute.xlu0 %1387 }
 0x232   :  { %2264 = vmatprep.mubr.f32.mxu1 %v2680_v36 }
 0x233   :  { %v4216_v17 = vpop.f32.mrf.mxu1 }
 0x235   :  { %v4221_v61 = vpop.f32.mrf.mxu1  ;;  %2265 = vmatmul.mubr.f32.gmra.mxu1 %v2679_v59  ;;  %v2701_v59 = vld [vmem:[%s4688_s3 + $0x3e0] sm:$0xff] }
 0x236   :  { %2270 = vmatprep.mubr.f32.mxu1 %v2682_v15 }
 0x237   :  { %v4226_v10 = vpop.f32.mrf.mxu1 }
 0x239   :  { %v4233_v44 = vpop.f32.mrf.mxu1  ;;  %2271 = vmatmul.mubr.f32.gmra.mxu1 %v2681_v5  ;;  %v2704_v5 = vld [vmem:[%s4688_s3 + $0x3f8] sm:$0xff] }
 0x23a   :  { %2276 = vmatprep.mubr.f32.mxu1 %v2684_v3 }
 0x23b   :  { %v4238_v57 = vpop.f32.mrf.mxu1 }
 0x23d   :  { %v4243_v19 = vpop.f32.mrf.mxu1  ;;  %2277 = vmatmul.mubr.f32.gmra.mxu1 %v2683_v23  ;;  %v2703_v23 = vld [vmem:[%s4688_s3 + $0x3f0] sm:$0xff] }
 0x23e   :  { %2282 = vmatprep.mubr.f32.mxu1 %v2686_v47  ;;  %v4334_v47 = vpop.permute.xlu0 %1382 }
 0x23f   :  { %v4250_v28 = vpop.f32.mrf.mxu1 }
 0x241   :  { %v4255_v43 = vpop.f32.mrf.mxu1  ;;  %2283 = vmatmul.mubr.f32.gmra.mxu1 %v2685_v58 }
 0x242   :  { %2288 = vmatprep.mubr.f32.mxu1 %v2688_v13 }
 0x243   :  { %v4260_v11 = vpop.f32.mrf.mxu1 }
 0x245   :  { %v4267_v37 = vpop.f32.mrf.mxu1  ;;  %2289 = vmatmul.mubr.f32.gmra.mxu1 %v2687_v41 }
 0x246   :  { %2294 = vmatprep.mubr.f32.mxu1 %v2690_v63 }
 0x247   :  { %v4272_v54 = vpop.f32.mrf.mxu1 }
 0x249   :  { %v4277_v60 = vpop.f32.mrf.mxu1  ;;  %2295 = vmatmul.mubr.f32.gmra.mxu1 %v2689_v1 }
 0x24a   :  { %2300 = vmatprep.mubr.f32.mxu1 %v2692_v62 }
 0x24b   :  { %v4284_v20 = vpop.f32.mrf.mxu1 }
 0x24d   :  { %v4289_v53 = vpop.f32.mrf.mxu1  ;;  %2301 = vmatmul.mubr.f32.gmra.mxu1 %v2691_v25  ;;  %v4339_v25 = vpop.permute.xlu0 %1537 }
 0x24e   :  { %2306 = vmatprep.mubr.f32.mxu1 %v2694_v2 }
 0x24f   :  { %v4294_v18 = vpop.f32.mrf.mxu1 }
 0x251   :  { %v4301_v49 = vpop.f32.mrf.mxu1  ;;  %2307 = vmatmul.mubr.f32.gmra.mxu1 %v2693_v26 }
 0x252   :  { %2312 = vmatprep.mubr.f32.mxu1 %v2696_v56 }
 0x253   :  { %v1668_v14 = vpop.f32.mrf.mxu1 }
 0x255   :  { %v1672_v34 = vpop.f32.mrf.mxu1  ;;  %2313 = vmatmul.mubr.f32.gmra.mxu1 %v2695_v30 }
 0x256   :  { %2318 = vmatprep.mubr.f32.mxu1 %v2698_v4 }
 0x257   :  { %v1674_v45 = vpop.f32.mrf.mxu1 }
 0x259   :  { %v1678_v42 = vpop.f32.mrf.mxu1  ;;  %2319 = vmatmul.mubr.f32.gmra.mxu1 %v2697_v39 }
 0x25a   :  { %2324 = vmatprep.mubr.f32.mxu1 %v2700_v50 }
 0x25b   :  { %v1680_v6 = vpop.f32.mrf.mxu1 }
 0x25d   :  { %v1684_v36 = vpop.f32.mrf.mxu1  ;;  %2325 = vmatmul.mubr.f32.gmra.mxu1 %v2699_v33  ;;  %v1681_v33 = vadd.f32 %v1680_v6, %v4160_v27  ;;  %v1669_v6 = vadd.f32 %v1668_v14, %v4182_v51  ;;  %v1657_v14 = vadd.f32 %v4284_v20, %v4214_v46 }
 0x25e   :  { %2330 = vmatprep.mubr.f32.mxu1 %v2702_v22  ;;  %v1685_v4 = vadd.f32 %v1684_v36, %v4149_v7 }
 0x25f   :  { %v1686_v15 = vpop.f32.mrf.mxu1 }
 0x260   :  { %v1687_v56 = vadd.f32 %v1686_v15, %v4149_v7  ;;  %v4353_v15 = vpop.permute.xlu0 %1532  ;;  %v1673_v7 = vadd.f32 %v1672_v34, %v4171_v24  ;;  %v1823_v36 = vmax.f32 %v1685_v4, 0.0 }
 0x261   :  { %v1690_v3 = vpop.f32.mrf.mxu1  ;;  %2331 = vmatmul.mubr.f32.gmra.mxu1 %v2701_v59 }
 0x262   :  { %2336 = vmatprep.mubr.f32.mxu1 %v2704_v5  ;;  %v1691_v2 = vadd.f32 %v1690_v3, %v4138_v9  ;;  %v1824_v3 = vmax.f32 %v1687_v56, 0.0  ;;  %v1819_v34 = vmax.f32 %v1673_v7, 0.0 }
 0x263   :  { %v1692_v58 = vpop.f32.mrf.mxu1 }
 0x264   :  { %v1693_v1 = vadd.f32 %v1692_v58, %v4138_v9  ;;  %v1825_v59 = vmax.f32 %v1691_v2, 0.0  ;;  %v1675_v9 = vadd.f32 %v1674_v45, %v4171_v24  ;;  %v1822_v58 = vmax.f32 %v1681_v33, 0.0 }
 0x265   :  { %v1696_v13 = vpop.f32.mrf.mxu1  ;;  %2337 = vmatmul.mubr.f32.gmra.mxu1 %v2703_v23  ;;  %v1663_v45 = vadd.f32 %v4294_v18, %v4197_v12  ;;  %v1661_v24 = vadd.f32 %v4289_v53, %v4197_v12  ;;  %v1651_v12 = vadd.f32 %v4272_v54, %v4231_v8  ;;  %v1649_v2 = vadd.f32 %v4267_v37, %v4231_v8 }
 0x266   :  { %v1697_v41 = vadd.f32 %v1696_v13, %v4127_v31  ;;  %v1826_v22 = vmax.f32 %v1693_v1, 0.0  ;;  %v1655_v1 = vadd.f32 %v4277_v60, %v4214_v46  ;;  %v1814_v46 = vmax.f32 %v1657_v14, 0.0 }
 0x267   :  { %v1698_v63 = vpop.f32.mrf.mxu1  ;;  %v1816_v53 = vmax.f32 %v1663_v45, 0.0  ;;  %v1815_v20 = vmax.f32 %v1661_v24, 0.0  ;;  %v1643_v60 = vadd.f32 %v4255_v43, %v4248_v35  ;;  %v1639_v54 = vadd.f32 %v4250_v28, %v4265_v21 }
 0x268   :  { %v1699_v62 = vadd.f32 %v1698_v63, %v4127_v31  ;;  %v1827_v39 = vmax.f32 %v1697_v41, 0.0  ;;  %v1679_v31 = vadd.f32 %v1678_v42, %v4160_v27  ;;  %v1667_v27 = vadd.f32 %v4301_v49, %v4182_v51  ;;  %v4371_v49 = vpop.permute.xlu0 %1527 }
 0x269   :  { %v4342_v26 = vpop.f32.mrf.mxu1  ;;  %v1820_v41 = vmax.f32 %v1675_v9, 0.0  ;;  %v1818_v51 = vmax.f32 %v1669_v6, 0.0  ;;  %v1813_v4 = vmax.f32 %v1655_v1, 0.0  ;;  %v1812_v8 = vmax.f32 %v1651_v12, 0.0 }
 0x26a   :  { %v1828_v30 = vmax.f32 %v1699_v62, 0.0  ;;  %v1821_v42 = vmax.f32 %v1679_v31, 0.0  ;;  %v1817_v18 = vmax.f32 %v1667_v27, 0.0  ;;  %v1637_v33 = vadd.f32 %v4243_v19, %v4265_v21 }
 0x26b   :  { %v4346_v50 = vpop.f32.mrf.mxu1  ;;  %v1631_v31 = vadd.f32 %v4233_v44, %v4282_v48  ;;  %v1809_v28 = vmax.f32 %v1643_v60, 0.0  ;;  %v1627_v9 = vadd.f32 %v4226_v10, %v4299_v38  ;;  %v1808_v19 = vmax.f32 %v1639_v54, 0.0 }
 0x26c   :  { %2482 = vmatprep.subr.mxu1 %v1828_v30  ;;  %v1645_v30 = vadd.f32 %v4260_v11, %v4248_v35  ;;  %v4391_v37 = vpop.permute.xlu0 %1522  ;;  %v1811_v11 = vmax.f32 %v1649_v2, 0.0  ;;  %v1633_v35 = vadd.f32 %v4238_v57, %v4282_v48  ;;  %v1625_v21 = vadd.f32 %v4221_v61, %v4299_v38 }
 0x26d   :  { %v4350_v5 = vpop.f32.mrf.mxu1  ;;  %2483 = vmatpush1.msra.mxu1 %v1827_v39  ;;  %v1621_v57 = vadd.f32 %v4216_v17, %v4312_v16  ;;  %v1805_v10 = vmax.f32 %v1631_v31, 0.0  ;;  %v1615_v61 = vadd.f32 %v4204_v29, %v4323_v55  ;;  %v1804_v38 = vmax.f32 %v1627_v9, 0.0 }
 0x26e   :  { %2484 = vmatprep.subr.mxu1 %v1826_v22  ;;  %v1810_v43 = vmax.f32 %v1645_v30, 0.0  ;;  %v1806_v44 = vmax.f32 %v1633_v35, 0.0  ;;  %v1803_v17 = vmax.f32 %v1625_v21, 0.0 }
 0x26f   :  { %v4356_v23 = vpop.f32.mrf.mxu1  ;;  %2485 = vmatpush1.msra.mxu1 %v1825_v59  ;;  %v1800_v29 = vmax.f32 %v1615_v61, 0.0 }
 0x270   :  { %2486 = vmatprep.subr.mxu1 %v1824_v3  ;;  %v1807_v3 = vmax.f32 %v1637_v33, 0.0  ;;  %v4411_v48 = vpop.permute.xlu0 %1517 }
 0x271   :  { %v4361_v13 = vpop.f32.mrf.mxu1  ;;  %2487 = vmatpush1.msra.mxu1 %v1823_v36  ;;  %v1619_v36 = vadd.f32 %v4209_v52, %v4312_v16  ;;  %v1802_v52 = vmax.f32 %v1621_v57, 0.0  ;;  %v1607_v16 = vadd.f32 %v4187_v0, %v4334_v47 }
 0x272   :  { %2488 = vmatprep.subr.mxu1 %v1822_v58  ;;  %v1613_v58 = vadd.f32 %v4199_v40, %v4323_v55 }
 0x273   :  { %v4367_v63 = vpop.f32.mrf.mxu1  ;;  %2489 = vmatpush1.msra.mxu1 %v1821_v42  ;;  %v1609_v42 = vadd.f32 %v4192_v32, %v4334_v47  ;;  %v1801_v45 = vmax.f32 %v1619_v36, 0.0  ;;  %v4433_v32 = vpop.permute.xlu1 %2003  ;;  %v1797_v14 = vmax.f32 %v1607_v16, 0.0 }
 0x274   :  { %2490 = vmatprep.subr.mxu1 %v1820_v41  ;;  %v4429_v24 = vpop.permute.xlu0 %1512  ;;  %v1799_v40 = vmax.f32 %v1613_v58, 0.0 }
 0x275   :  { %v4375_v62 = vpop.f32.mrf.mxu1  ;;  %2491 = vmatpush1.msra.mxu1 %v1819_v34  ;;  %v1798_v34 = vmax.f32 %v1609_v42, 0.0 }
 0x276   :  { %2492 = vmatprep.subr.mxu1 %v1818_v51 }
 0x277   :  { %v4381_v56 = vpop.f32.mrf.mxu1  ;;  %2493 = vmatpush1.msra.mxu1 %v1817_v18  ;;  %v4439_v18 = vpop.permute.xlu1 %1998 }
 0x278   :  { %2494 = vmatprep.subr.mxu1 %v1816_v53  ;;  %v1508_v47 = vpop.permute.xlu0 %1507 }
 0x279   :  { %v4387_v39 = vpop.f32.mrf.mxu1  ;;  %2495 = vmatpush1.msra.mxu1 %v1815_v20 }
 0x27a   :  { %2496 = vmatprep.subr.mxu1 %v1814_v46 }
 0x27b   :  { %v4395_v22 = vpop.f32.mrf.mxu1  ;;  %2497 = vmatpush1.msra.mxu1 %v1813_v4  ;;  %v4443_v30 = vpop.permute.xlu1 %1993 }
 0x27c   :  { %2498 = vmatprep.subr.mxu1 %v1812_v8  ;;  %v4441_v2 = vpop.permute.xlu0 %1502 }
 0x27d   :  { %v4401_v59 = vpop.f32.mrf.mxu1  ;;  %2499 = vmatpush1.msra.mxu1 %v1811_v11 }
 0x27e   :  { %2500 = vmatprep.subr.mxu1 %v1810_v43 }
 0x27f   :  { %v4407_v7 = vpop.f32.mrf.mxu1  ;;  %2501 = vmatpush1.msra.mxu1 %v1809_v28  ;;  %v4447_v8 = vpop.permute.xlu1 %1988 }
 0x280   :  { %2502 = vmatprep.subr.mxu1 %v1808_v19  ;;  %v4445_v4 = vpop.permute.xlu0 %1497 }
 0x281   :  { %v4415_v6 = vpop.f32.mrf.mxu1  ;;  %2503 = vmatpush1.msra.mxu1 %v1807_v3 }
 0x282   :  { %2504 = vmatprep.subr.mxu1 %v1806_v44 }
 0x283   :  { %v4421_v27 = vpop.f32.mrf.mxu1  ;;  %2505 = vmatpush1.msra.mxu1 %v1805_v10  ;;  %v4451_v31 = vpop.permute.xlu1 %1983 }
 0x284   :  { %2506 = vmatprep.subr.mxu1 %v1804_v38  ;;  %v4449_v35 = vpop.permute.xlu0 %1492 }
 0x285   :  { %v4427_v41 = vpop.f32.mrf.mxu1  ;;  %2507 = vmatpush1.msra.mxu1 %v1803_v17 }
 0x286   :  { %2508 = vmatprep.subr.mxu1 %v1802_v52 }
 0x287   :  { %v4431_v55 = vpop.f32.mrf.mxu1  ;;  %2509 = vmatpush1.msra.mxu1 %v1801_v45  ;;  %v4455_v3 = vpop.permute.xlu1 %1978 }
 0x288   :  { %2510 = vmatprep.subr.mxu1 %v1800_v29  ;;  %v4453_v19 = vpop.permute.xlu0 %1487 }
 0x289   :  { %v4435_v51 = vpop.f32.mrf.mxu1  ;;  %2511 = vmatpush1.msra.mxu1 %v1799_v40 }
 0x28a   :  { %2512 = vmatprep.subr.mxu1 %v1798_v34 }
 0x28b   :  { %v4437_v0 = vpop.f32.mrf.mxu1  ;;  %2513 = vmatpush1.msra.mxu1 %v1797_v14  ;;  %v4470_v34 = vpop.permute.xlu1 %1973 }
 0x28c   :  { %v4464_v42 = vpop.permute.xlu0 %1482 }
 0x28d   :  { %v1756_v1 = vpop.f32.mrf.mxu1 }
 0x28f   :  { %v1758_v12 = vpop.f32.mrf.mxu1 }
 0x291   :  { %v1762_v53 = vpop.f32.mrf.mxu1 }
 0x293   :  { %v1764_v20 = vpop.f32.mrf.mxu1 }
 0x295   :  { %v1768_v46 = vpop.f32.mrf.mxu1 }
 0x297   :  { %v1770_v60 = vpop.f32.mrf.mxu1 }
 0x299   :  { %v1774_v54 = vpop.f32.mrf.mxu1 }
 0x29b   :  { %v1776_v33 = vpop.f32.mrf.mxu1 }
 0x29c   :  { %v1777_v29 = vadd.f32 %v1776_v33, %v4391_v37  ;;  %v1765_v33 = vadd.f32 %v1764_v20, %v4429_v24  ;;  %v1753_v20 = vadd.f32 %v4437_v0, %v4441_v2 }
 0x29d   :  { %v1780_v11 = vpop.f32.mrf.mxu1 }
 0x29e   :  { %v1781_v52 = vadd.f32 %v1780_v11, %v4371_v49 }
 0x29f   :  { %v1782_v43 = vpop.f32.mrf.mxu1 }
 0x2a0   :  { %v1783_v58 = vadd.f32 %v1782_v43, %v4371_v49  ;;  %v1771_v43 = vadd.f32 %v1770_v60, %v4411_v48  ;;  %v1769_v49 = vadd.f32 %v1768_v46, %v4411_v48  ;;  %v1855_v11 = vmax.f32 %v1781_v52, 0.0 }
 0x2a1   :  { %v1786_v28 = vpop.f32.mrf.mxu1  ;;  %v1759_v60 = vadd.f32 %v1758_v12, %v1508_v47  ;;  %v1757_v48 = vadd.f32 %v1756_v1, %v1508_v47  ;;  %v1747_v12 = vadd.f32 %v4431_v55, %v4445_v4  ;;  %v1745_v52 = vadd.f32 %v4427_v41, %v4445_v4 }
 0x2a2   :  { %v1787_v61 = vadd.f32 %v1786_v28, %v4353_v15  ;;  %v1856_v28 = vmax.f32 %v1783_v58, 0.0  ;;  %v1851_v46 = vmax.f32 %v1769_v49, 0.0  ;;  %v1850_v58 = vmax.f32 %v1765_v33, 0.0 }
 0x2a3   :  { %v1788_v9 = vpop.f32.mrf.mxu1  ;;  %v1848_v47 = vmax.f32 %v1759_v60, 0.0  ;;  %v1739_v55 = vadd.f32 %v4415_v6, %v4449_v35  ;;  %v1735_v41 = vadd.f32 %v4407_v7, %v4453_v19  ;;  %v1844_v4 = vmax.f32 %v1747_v12, 0.0 }
 0x2a4   :  { %v1789_v36 = vadd.f32 %v1788_v9, %v4353_v15  ;;  %v1857_v15 = vmax.f32 %v1787_v61, 0.0  ;;  %v1727_v49 = vadd.f32 %v4387_v39, %v4464_v42 }
 0x2a5   :  { %v1792_v21 = vpop.f32.mrf.mxu1 }
 0x2a6   :  { %v1793_v57 = vadd.f32 %v1792_v21, %v4339_v25  ;;  %v1858_v40 = vmax.f32 %v1789_v36, 0.0  ;;  %v1854_v21 = vmax.f32 %v1777_v29, 0.0  ;;  %v1852_v36 = vmax.f32 %v1771_v43, 0.0 }
 0x2a7   :  { %v1794_v44 = vpop.f32.mrf.mxu1 }
 0x2a8   :  { %v1795_v10 = vadd.f32 %v1794_v44, %v4339_v25  ;;  %v1859_v16 = vmax.f32 %v1793_v57, 0.0  ;;  %v1775_v25 = vadd.f32 %v1774_v54, %v4391_v37  ;;  %v1478_v57 = vpop.permute.xlu0 %1477  ;;  %v1763_v37 = vadd.f32 %v1762_v53, %v4429_v24 }
 0x2a9   :  { %v4461_v38 = vpop.f32.mrf.mxu1  ;;  %v1751_v24 = vadd.f32 %v4435_v51, %v4441_v2  ;;  %v1741_v51 = vadd.f32 %v4421_v27, %v4449_v35  ;;  %v1846_v2 = vmax.f32 %v1753_v20, 0.0  ;;  %v1843_v27 = vmax.f32 %v1745_v52, 0.0 }
 0x2aa   :  { %v1860_v17 = vmax.f32 %v1795_v10, 0.0  ;;  %v1853_v54 = vmax.f32 %v1775_v25, 0.0  ;;  %v4483_v10 = vpop.permute.xlu1 %1968  ;;  %v1849_v53 = vmax.f32 %v1763_v37, 0.0  ;;  %v1723_v33 = vadd.f32 %v4381_v56, %v1478_v57 }
 0x2ab   :  { %v4467_v45 = vpop.f32.mrf.mxu1  ;;  %v1842_v6 = vmax.f32 %v1741_v51, 0.0  ;;  %v2410_v51 = vld [vmem:[%s4691_s6 + $0x8] sm:$0xff] }
 0x2ac   :  { %2514 = vmatprep.subr.mxu1 %v1860_v17  ;;  %v1473_v1 = vpop.permute.xlu0 %1472  ;;  %2475 = vmatprep.mubr.f32.mxu0 %v2410_v51 }
 0x2ad   :  { %v4473_v14 = vpop.f32.mrf.mxu1  ;;  %2515 = vmatpush2.msra.mxu1 %v1859_v16  ;;  %v1847_v16 = vmax.f32 %v1757_v48, 0.0  ;;  %v1715_v39 = vadd.f32 %v4361_v13, %v1473_v1  ;;  %v1836_v48 = vmax.f32 %v1723_v33, 0.0 }
 0x2ae   :  { %2516 = vmatprep.subr.mxu1 %v1858_v40  ;;  %v4501_v29 = vpop.permute.xlu1 %1963  ;;  %v1845_v40 = vmax.f32 %v1751_v24, 0.0 }
 0x2af   :  { %v4477_v9 = vpop.f32.mrf.mxu1  ;;  %2517 = vmatpush2.msra.mxu1 %v1857_v15  ;;  %v1733_v15 = vadd.f32 %v4401_v59, %v4453_v19  ;;  %v1840_v59 = vmax.f32 %v1735_v41, 0.0 }
 0x2b0   :  { %2518 = vmatprep.subr.mxu1 %v1856_v28  ;;  %v1729_v28 = vadd.f32 %v4395_v22, %v4464_v42  ;;  %v1468_v35 = vpop.permute.xlu0 %1467  ;;  %v1837_v42 = vmax.f32 %v1727_v49, 0.0 }
 0x2b1   :  { %v4481_v44 = vpop.f32.mrf.mxu1  ;;  %2519 = vmatpush2.msra.mxu1 %v1855_v11  ;;  %v1841_v11 = vmax.f32 %v1739_v55, 0.0  ;;  %v1839_v37 = vmax.f32 %v1733_v15, 0.0  ;;  %v1711_v56 = vadd.f32 %v4356_v23, %v1468_v35 }
 0x2b2   :  { %2520 = vmatprep.subr.mxu1 %v1854_v21  ;;  %v4520_v19 = vpop.permute.xlu1 %1958  ;;  %v1721_v21 = vadd.f32 %v4375_v62, %v1478_v57  ;;  %v1838_v60 = vmax.f32 %v1729_v28, 0.0  ;;  %v1709_v62 = vadd.f32 %v4350_v5, %v1468_v35 }
 0x2b3   :  { %v4485_v61 = vpop.f32.mrf.mxu1  ;;  %2521 = vmatpush2.msra.mxu1 %v1853_v54  ;;  %v1717_v54 = vadd.f32 %v4367_v63, %v1473_v1  ;;  %v1832_v23 = vmax.f32 %v1711_v56, 0.0 }
 0x2b4   :  { %2522 = vmatprep.subr.mxu1 %v1852_v36  ;;  %v1835_v57 = vmax.f32 %v1721_v21, 0.0 }
 0x2b5   :  { %v4491_v17 = vpop.f32.mrf.mxu1  ;;  %2523 = vmatpush2.msra.mxu1 %v1851_v46  ;;  %v1463_v46 = vpop.permute.xlu0 %1462 }
 0x2b6   :  { %2524 = vmatprep.subr.mxu1 %v1850_v58  ;;  %v1705_v63 = vadd.f32 %v4346_v50, %v1463_v46  ;;  %v1834_v58 = vmax.f32 %v1717_v54, 0.0  ;;  %v4534_v13 = vpop.permute.xlu1 %1953  ;;  %v1703_v24 = vadd.f32 %v4342_v26, %v1463_v46  ;;  %v2408_v50 = vld [vmem:[%s4690_s5 + $0x8] sm:$0xff]  ;;  %v2407_v26 = vld [vmem:[%s4690_s5] sm:$0xff] }
 0x2b7   :  { %v4497_v0 = vpop.f32.mrf.mxu1  ;;  %2525 = vmatpush2.msra.mxu1 %v1849_v53  ;;  %v1833_v53 = vmax.f32 %v1715_v39, 0.0  ;;  %2546 = vmatprep.mubr.f32.mxu1 %v2408_v50 }
 0x2b8   :  { %2526 = vmatprep.subr.mxu1 %v1848_v47  ;;  %v1831_v47 = vmax.f32 %v1709_v62, 0.0  ;;  %v1830_v1 = vmax.f32 %v1705_v63, 0.0  ;;  %v1829_v52 = vmax.f32 %v1703_v24, 0.0 }
 0x2b9   :  { %v4505_v25 = vpop.f32.mrf.mxu1  ;;  %2527 = vmatpush2.msra.mxu1 %v1847_v16 }
 0x2ba   :  { %2528 = vmatprep.subr.mxu1 %v1846_v2  ;;  %v4552_v2 = vpop.permute.xlu1 %1948 }
 0x2bb   :  { %v4511_v43 = vpop.f32.mrf.mxu1  ;;  %2529 = vmatpush2.msra.mxu1 %v1845_v40 }
 0x2bc   :  { %2530 = vmatprep.subr.mxu1 %v1844_v4 }
 0x2bd   :  { %v4517_v7 = vpop.f32.mrf.mxu1  ;;  %2531 = vmatpush2.msra.mxu1 %v1843_v27 }
 0x2be   :  { %2532 = vmatprep.subr.mxu1 %v1842_v6  ;;  %v4554_v4 = vpop.permute.xlu1 %1943 }
 0x2bf   :  { %v4523_v22 = vpop.f32.mrf.mxu1  ;;  %2533 = vmatpush2.msra.mxu1 %v1841_v11 }
 0x2c0   :  { %2534 = vmatprep.subr.mxu1 %v1840_v59 }
 0x2c1   :  { %v4527_v36 = vpop.f32.mrf.mxu1  ;;  %2535 = vmatpush2.msra.mxu1 %v1839_v37 }
 0x2c2   :  { %2536 = vmatprep.subr.mxu1 %v1838_v60  ;;  %v4556_v6 = vpop.permute.xlu1 %1938 }
 0x2c3   :  { %v4531_v20 = vpop.f32.mrf.mxu1  ;;  %2537 = vmatpush2.msra.mxu1 %v1837_v42 }
 0x2c4   :  { %2538 = vmatprep.subr.mxu1 %v1836_v48 }
 0x2c5   :  { %v4537_v12 = vpop.f32.mrf.mxu1  ;;  %2539 = vmatpush2.msra.mxu1 %v1835_v57 }
 0x2c6   :  { %2540 = vmatprep.subr.mxu1 %v1834_v58  ;;  %v4558_v33 = vpop.permute.xlu1 %1933 }
 0x2c7   :  { %v4539_v5 = vpop.f32.mrf.mxu1  ;;  %2541 = vmatpush2.msra.mxu1 %v1833_v53 }
 0x2c8   :  { %2542 = vmatprep.subr.mxu1 %v1832_v23 }
 0x2c9   :  { %v4544_v16 = vpop.f32.mrf.mxu1  ;;  %2543 = vmatpush2.msra.mxu1 %v1831_v47 }
 0x2ca   :  { %2544 = vmatprep.subr.mxu1 %v1830_v1  ;;  %v4560_v54 = vpop.permute.xlu1 %1928 }
 0x2cb   :  { %v2202_v55 = vpop.f32.mrf.mxu1  ;;  %2545 = vmatpush2.msra.mxu1 %v1829_v52 }
 0x2cc   :  { %2547 = vmatmul.mubr.f32.vlgmr.msra.gmra.mxu1 %v2407_v26 }
 0x2cd   :  { %v2206_v40 = vpop.f32.mrf.mxu1 }
 0x2ce   :  { %v4565_v62 = vpop.permute.xlu1 %2083 }
 0x2cf   :  { %v2208_v41 = vpop.f32.mrf.mxu1 }
 0x2d1   :  { %v2212_v15 = vpop.f32.mrf.mxu1 }
 0x2d3   :  { %v2214_v27 = vpop.f32.mrf.mxu1 }
 0x2d5   :  { %v2218_v28 = vpop.f32.mrf.mxu1 }
 0x2d7   :  { %v2220_v35 = vpop.f32.mrf.mxu1 }
 0x2d9   :  { %v2224_v49 = vpop.f32.mrf.mxu1 }
 0x2db   :  { %v2226_v11 = vpop.f32.mrf.mxu1 }
 0x2dc   :  { %v2227_v1 = vadd.f32 %v2226_v11, %v4447_v8  ;;  %v2215_v11 = vadd.f32 %v2214_v27, %v4455_v3  ;;  %v2203_v27 = vadd.f32 %v2202_v55, %v4483_v10 }
 0x2dd   :  { %v2230_v59 = vpop.f32.mrf.mxu1 }
 0x2de   :  { %v2231_v53 = vadd.f32 %v2230_v59, %v4443_v30 }
 0x2df   :  { %v2232_v21 = vpop.f32.mrf.mxu1 }
 0x2e0   :  { %v2233_v58 = vadd.f32 %v2232_v21, %v4443_v30  ;;  %v4579_v21 = vpop.permute.xlu1 %2078  ;;  %v2219_v30 = vadd.f32 %v2218_v28, %v4451_v31  ;;  %v2369_v59 = vmax.f32 %v2231_v53, 0.0 }
 0x2e1   :  { %v2236_v37 = vpop.f32.mrf.mxu1 }
 0x2e2   :  { %v2237_v57 = vadd.f32 %v2236_v37, %v4439_v18  ;;  %v2370_v51 = vmax.f32 %v2233_v58, 0.0  ;;  %v2365_v28 = vmax.f32 %v2219_v30, 0.0 }
 0x2e3   :  { %v2238_v60 = vpop.f32.mrf.mxu1 }
 0x2e4   :  { %v2239_v48 = vadd.f32 %v2238_v60, %v4439_v18  ;;  %v2371_v52 = vmax.f32 %v2237_v57, 0.0  ;;  %v2221_v18 = vadd.f32 %v2220_v35, %v4451_v31  ;;  %v2368_v60 = vmax.f32 %v2227_v1, 0.0 }
 0x2e5   :  { %v2242_v39 = vpop.f32.mrf.mxu1  ;;  %v2209_v35 = vadd.f32 %v2208_v41, %v4470_v34  ;;  %v2207_v31 = vadd.f32 %v2206_v40, %v4470_v34  ;;  %v2197_v34 = vadd.f32 %v4539_v5, %v4501_v29  ;;  %v2195_v41 = vadd.f32 %v4537_v12, %v4501_v29 }
 0x2e6   :  { %v2243_v42 = vadd.f32 %v2242_v39, %v4433_v32  ;;  %v2372_v50 = vmax.f32 %v2239_v48, 0.0  ;;  %v2364_v48 = vmax.f32 %v2215_v11, 0.0  ;;  %v2185_v5 = vadd.f32 %v4523_v22, %v4534_v13 }
 0x2e7   :  { %v2244_v56 = vpop.f32.mrf.mxu1  ;;  %v2362_v40 = vmax.f32 %v2209_v35, 0.0  ;;  %v2361_v55 = vmax.f32 %v2207_v31, 0.0  ;;  %v2358_v29 = vmax.f32 %v2197_v34, 0.0  ;;  %v2183_v1 = vadd.f32 %v4517_v7, %v4534_v13 }
 0x2e8   :  { %v2245_v46 = vadd.f32 %v2244_v56, %v4433_v32  ;;  %v2373_v23 = vmax.f32 %v2243_v42, 0.0  ;;  %v2225_v32 = vadd.f32 %v2224_v49, %v4447_v8  ;;  %v2213_v8 = vadd.f32 %v2212_v15, %v4455_v3 }
 0x2e9   :  { %v4568_v63 = vpop.f32.mrf.mxu1  ;;  %v2366_v42 = vmax.f32 %v2221_v18, 0.0  ;;  %v2201_v3 = vadd.f32 %v4544_v16, %v4483_v10  ;;  %v2360_v10 = vmax.f32 %v2203_v27, 0.0  ;;  %v2189_v16 = vadd.f32 %v4527_v36, %v4520_v19 }
 0x2ea   :  { %v2374_v24 = vmax.f32 %v2245_v46, 0.0  ;;  %v2367_v49 = vmax.f32 %v2225_v32, 0.0  ;;  %v4593_v46 = vpop.permute.xlu1 %2073  ;;  %v2363_v15 = vmax.f32 %v2213_v8, 0.0  ;;  %v2177_v32 = vadd.f32 %v4505_v25, %v4552_v2 }
 0x2eb   :  { %v4572_v47 = vpop.f32.mrf.mxu1  ;;  %v2359_v53 = vmax.f32 %v2201_v3, 0.0  ;;  %v2355_v22 = vmax.f32 %v2189_v16, 0.0  ;;  %v2173_v18 = vadd.f32 %v4497_v0, %v4554_v4  ;;  %v2354_v7 = vmax.f32 %v2185_v5, 0.0 }
 0x2ec   :  { %2411 = vmatprep.subr.mxu0 %v2374_v24  ;;  %v2191_v24 = vadd.f32 %v4531_v20, %v4520_v19  ;;  %v2357_v20 = vmax.f32 %v2195_v41, 0.0  ;;  %v2179_v19 = vadd.f32 %v4511_v43, %v4552_v2  ;;  %v2171_v13 = vadd.f32 %v4491_v17, %v4554_v4 }
 0x2ed   :  { %v4576_v26 = vpop.f32.mrf.mxu1  ;;  %2412 = vmatpush1.msra.mxu0 %v2373_v23  ;;  %v2167_v43 = vadd.f32 %v4485_v61, %v4556_v6  ;;  %v2351_v0 = vmax.f32 %v2177_v32, 0.0  ;;  %v2161_v17 = vadd.f32 %v4477_v9, %v4558_v33  ;;  %v2350_v4 = vmax.f32 %v2173_v18, 0.0 }
 0x2ee   :  { %2413 = vmatprep.subr.mxu0 %v2372_v50  ;;  %v4613_v12 = vpop.permute.xlu1 %2068  ;;  %v2356_v36 = vmax.f32 %v2191_v24, 0.0  ;;  %v2352_v25 = vmax.f32 %v2179_v19, 0.0  ;;  %v2349_v61 = vmax.f32 %v2171_v13, 0.0 }
 0x2ef   :  { %v4582_v37 = vpop.f32.mrf.mxu1  ;;  %2414 = vmatpush1.msra.mxu0 %v2371_v52  ;;  %v2346_v9 = vmax.f32 %v2161_v17, 0.0 }
 0x2f0   :  { %2415 = vmatprep.subr.mxu0 %v2370_v51  ;;  %v2353_v51 = vmax.f32 %v2183_v1, 0.0 }
 0x2f1   :  { %v4586_v39 = vpop.f32.mrf.mxu1  ;;  %2416 = vmatpush1.msra.mxu0 %v2369_v59  ;;  %v2165_v59 = vadd.f32 %v4481_v44, %v4556_v6  ;;  %v2348_v44 = vmax.f32 %v2167_v43, 0.0  ;;  %v2153_v6 = vadd.f32 %v4461_v38, %v4560_v54 }
 0x2f2   :  { %2417 = vmatprep.subr.mxu0 %v2368_v60  ;;  %v4633_v2 = vpop.permute.xlu1 %2063  ;;  %v2159_v60 = vadd.f32 %v4473_v14, %v4558_v33 }
 0x2f3   :  { %v4590_v56 = vpop.f32.mrf.mxu1  ;;  %2418 = vmatpush1.msra.mxu0 %v2367_v49  ;;  %v2155_v49 = vadd.f32 %v4467_v45, %v4560_v54  ;;  %v2347_v35 = vmax.f32 %v2165_v59, 0.0  ;;  %v2343_v27 = vmax.f32 %v2153_v6, 0.0 }
 0x2f4   :  { %2419 = vmatprep.subr.mxu0 %v2366_v42  ;;  %v2345_v14 = vmax.f32 %v2159_v60, 0.0 }
 0x2f5   :  { %v4597_v57 = vpop.f32.mrf.mxu1  ;;  %2420 = vmatpush1.msra.mxu0 %v2365_v28  ;;  %v2344_v28 = vmax.f32 %v2155_v49, 0.0 }
 0x2f6   :  { %2421 = vmatprep.subr.mxu0 %v2364_v48  ;;  %v2059_v31 = vpop.permute.xlu1 %2058 }
 0x2f7   :  { %v4603_v58 = vpop.f32.mrf.mxu1  ;;  %2422 = vmatpush1.msra.mxu0 %v2363_v15 }
 0x2f8   :  { %2423 = vmatprep.subr.mxu0 %v2362_v40 }
 0x2f9   :  { %v4609_v23 = vpop.f32.mrf.mxu1  ;;  %2424 = vmatpush1.msra.mxu0 %v2361_v55 }
 0x2fa   :  { %2425 = vmatprep.subr.mxu0 %v2360_v10  ;;  %v2054_v38 = vpop.permute.xlu1 %2053 }
 0x2fb   :  { %v4617_v50 = vpop.f32.mrf.mxu1  ;;  %2426 = vmatpush1.msra.mxu0 %v2359_v53 }
 0x2fc   :  { %2427 = vmatprep.subr.mxu0 %v2358_v29 }
 0x2fd   :  { %v4623_v52 = vpop.f32.mrf.mxu1  ;;  %2428 = vmatpush1.msra.mxu0 %v2357_v20 }
 0x2fe   :  { %2429 = vmatprep.subr.mxu0 %v2356_v36  ;;  %v2049_v34 = vpop.permute.xlu1 %2048 }
 0x2ff   :  { %v4629_v30 = vpop.f32.mrf.mxu1  ;;  %2430 = vmatpush1.msra.mxu0 %v2355_v22 }
 0x300   :  { %2431 = vmatprep.subr.mxu0 %v2354_v7 }
 0x301   :  { %v4637_v11 = vpop.f32.mrf.mxu1  ;;  %2432 = vmatpush1.msra.mxu0 %v2353_v51 }
 0x302   :  { %2433 = vmatprep.subr.mxu0 %v2352_v25  ;;  %v2044_v24 = vpop.permute.xlu1 %2043 }
 0x303   :  { %v4643_v8 = vpop.f32.mrf.mxu1  ;;  %2434 = vmatpush1.msra.mxu0 %v2351_v0 }
 0x304   :  { %2435 = vmatprep.subr.mxu0 %v2350_v4 }
 0x305   :  { %v4649_v42 = vpop.f32.mrf.mxu1  ;;  %2436 = vmatpush1.msra.mxu0 %v2349_v61 }
 0x306   :  { %2437 = vmatprep.subr.mxu0 %v2348_v44  ;;  %v2039_v5 = vpop.permute.xlu1 %2038 }
 0x307   :  { %v4651_v33 = vpop.f32.mrf.mxu1  ;;  %2438 = vmatpush1.msra.mxu0 %v2347_v35 }
 0x308   :  { %2439 = vmatprep.subr.mxu0 %v2346_v9 }
 0x309   :  { %v2296_v45 = vpop.f32.mrf.mxu1  ;;  %2440 = vmatpush1.msra.mxu0 %v2345_v14 }
 0x30a   :  { %2441 = vmatprep.subr.mxu0 %v2344_v28  ;;  %v2034_v19 = vpop.permute.xlu1 %2033 }
 0x30b   :  { %v2298_v48 = vpop.f32.mrf.mxu1  ;;  %2442 = vmatpush1.msra.mxu0 %v2343_v27 }
 0x30d   :  { %v2302_v54 = vpop.f32.mrf.mxu1 }
 0x30e   :  { %v2029_v25 = vpop.permute.xlu1 %2028 }
 0x30f   :  { %v2304_v3 = vpop.f32.mrf.mxu1 }
 0x310   :  { %v2305_v28 = vadd.f32 %v2304_v3, %v2054_v38  ;;  %v2287_v3 = vadd.f32 %v4643_v8, %v2039_v5  ;;  %v2273_v8 = vadd.f32 %v4609_v23, %v2029_v25 }
 0x311   :  { %v2308_v15 = vpop.f32.mrf.mxu1 }
 0x312   :  { %v2309_v9 = vadd.f32 %v2308_v15, %v2059_v31 }
 0x313   :  { %v2310_v40 = vpop.f32.mrf.mxu1 }
 0x314   :  { %v2311_v6 = vadd.f32 %v2310_v40, %v2059_v31  ;;  %v2293_v40 = vadd.f32 %v4651_v33, %v2044_v24  ;;  %v2291_v31 = vadd.f32 %v4649_v42, %v2044_v24  ;;  %v2279_v33 = vadd.f32 %v4623_v52, %v2034_v19 }
 0x315   :  { %v2314_v41 = vpop.f32.mrf.mxu1  ;;  %v2275_v42 = vadd.f32 %v4617_v50, %v2029_v25  ;;  %v2388_v24 = vmax.f32 %v2287_v3, 0.0 }
 0x317   :  { %v2316_v55 = vpop.f32.mrf.mxu1 }
 0x318   :  { %v2317_v49 = vadd.f32 %v2316_v55, %v4633_v2  ;;  %v2299_v55 = vadd.f32 %v2298_v48, %v2049_v34  ;;  %v2285_v48 = vadd.f32 %v4637_v11, %v2039_v5 }
 0x319   :  { %v2320_v10 = vpop.f32.mrf.mxu1 }
 0x31a   :  { %v2321_v60 = vadd.f32 %v2320_v10, %v4613_v12  ;;  %v2398_v27 = vmax.f32 %v2317_v49, 0.0 }
 0x31b   :  { %v2322_v16 = vpop.f32.mrf.mxu1 }
 0x31c   :  { %v2323_v17 = vadd.f32 %v2322_v16, %v4613_v12  ;;  %v2399_v14 = vmax.f32 %v2321_v60, 0.0  ;;  %v2303_v12 = vadd.f32 %v2302_v54, %v2054_v38  ;;  %v2396_v16 = vmax.f32 %v2311_v6, 0.0 }
 0x31d   :  { %v2326_v53 = vpop.f32.mrf.mxu1  ;;  %v2392_v38 = vmax.f32 %v2299_v55, 0.0 }
 0x31e   :  { %v2327_v59 = vadd.f32 %v2326_v53, %v4593_v46  ;;  %v2400_v35 = vmax.f32 %v2323_v17, 0.0  ;;  %v2297_v53 = vadd.f32 %v2296_v45, %v2049_v34  ;;  %v2393_v15 = vmax.f32 %v2303_v12, 0.0 }
 0x31f   :  { %v2328_v29 = vpop.f32.mrf.mxu1  ;;  %v2281_v45 = vadd.f32 %v4629_v30, %v2034_v19  ;;  %v2390_v34 = vmax.f32 %v2293_v40, 0.0  ;;  %v2384_v19 = vmax.f32 %v2275_v42, 0.0 }
 0x320   :  { %v2329_v51 = vadd.f32 %v2328_v29, %v4593_v46  ;;  %v2401_v44 = vmax.f32 %v2327_v59, 0.0  ;;  %v2024_v46 = vpop.permute.xlu1 %2023  ;;  %v2391_v54 = vmax.f32 %v2297_v53, 0.0 }
 0x321   :  { %v2332_v1 = vpop.f32.mrf.mxu1  ;;  %v2269_v11 = vadd.f32 %v4603_v58, %v2024_v46  ;;  %v2386_v5 = vmax.f32 %v2281_v45, 0.0  ;;  %v2267_v30 = vadd.f32 %v4597_v57, %v2024_v46 }
 0x322   :  { %v2333_v13 = vadd.f32 %v2332_v1, %v4579_v21  ;;  %v2389_v1 = vmax.f32 %v2291_v31, 0.0 }
 0x323   :  { %v2334_v20 = vpop.f32.mrf.mxu1 }
 0x324   :  { %v2335_v18 = vadd.f32 %v2334_v20, %v4579_v21  ;;  %v2403_v61 = vmax.f32 %v2333_v13, 0.0  ;;  %v2315_v21 = vadd.f32 %v2314_v41, %v4633_v2  ;;  %v2395_v2 = vmax.f32 %v2309_v9, 0.0  ;;  %v2019_v29 = vpop.permute.xlu1 %2018 }
 0x325   :  { %v2338_v36 = vpop.f32.mrf.mxu1  ;;  %v2394_v41 = vmax.f32 %v2305_v28, 0.0  ;;  %v2263_v52 = vadd.f32 %v4590_v56, %v2019_v29  ;;  %v2261_v50 = vadd.f32 %v4586_v39, %v2019_v29  ;;  %v2381_v13 = vmax.f32 %v2267_v30, 0.0 }
 0x326   :  { %v2339_v32 = vadd.f32 %v2338_v36, %v4565_v62  ;;  %v2404_v4 = vmax.f32 %v2335_v18, 0.0  ;;  %v2397_v10 = vmax.f32 %v2315_v21, 0.0  ;;  %v2387_v36 = vmax.f32 %v2285_v48, 0.0 }
 0x327   :  { %v2340_v22 = vpop.f32.mrf.mxu1  ;;  %v2382_v18 = vmax.f32 %v2269_v11, 0.0 }
 0x328   :  { %v2341_v7 = vadd.f32 %v2340_v22, %v4565_v62  ;;  %v2405_v0 = vmax.f32 %v2339_v32, 0.0  ;;  %v2402_v62 = vmax.f32 %v2329_v51, 0.0  ;;  %v2014_v20 = vpop.permute.xlu1 %2013  ;;  %v2385_v32 = vmax.f32 %v2279_v33, 0.0 }
 0x329   :  { %v2383_v22 = vmax.f32 %v2273_v8, 0.0  ;;  %v2257_v23 = vadd.f32 %v4582_v37, %v2014_v20  ;;  %v2255_v58 = vadd.f32 %v4576_v26, %v2014_v20  ;;  %v2380_v51 = vmax.f32 %v2263_v52, 0.0  ;;  %v2409_v26 = vld [vmem:[%s4691_s6] sm:$0xff] }
 0x32a   :  { %v2406_v43 = vmax.f32 %v2341_v7, 0.0 }
 0x32b   :  { %v2378_v39 = vmax.f32 %v2257_v23, 0.0  ;;  %v2377_v25 = vmax.f32 %v2255_v58, 0.0 }
 0x32c   :  { %2443 = vmatprep.subr.mxu0 %v2406_v43  ;;  %v2009_v7 = vpop.permute.xlu1 %2008  ;;  %v2379_v43 = vmax.f32 %v2261_v50, 0.0 }
 0x32d   :  { %2444 = vmatpush2.msra.mxu0 %v2405_v0  ;;  %v2251_v57 = vadd.f32 %v4572_v47, %v2009_v7  ;;  %v2249_v56 = vadd.f32 %v4568_v63, %v2009_v7  ;;  %v2557_v63 = vpop.permute.xlu0 %2556 }
 0x32e   :  { %2445 = vmatprep.subr.mxu0 %v2404_v4 }
 0x32f   :  { %2446 = vmatpush2.msra.mxu0 %v2403_v61  ;;  %v2376_v37 = vmax.f32 %v2251_v57, 0.0  ;;  %v2375_v59 = vmax.f32 %v2249_v56, 0.0 }
 0x330   :  { %2447 = vmatprep.subr.mxu0 %v2402_v62 }
 0x331   :  { %2448 = vmatpush2.msra.mxu0 %v2401_v44 }
 0x332   :  { %2449 = vmatprep.subr.mxu0 %v2400_v35 }
 0x333   :  { %2450 = vmatpush2.msra.mxu0 %v2399_v14 }
 0x334   :  { %2451 = vmatprep.subr.mxu0 %v2398_v27 }
 0x335   :  { %2452 = vmatpush2.msra.mxu0 %v2397_v10 }
 0x336   :  { %2453 = vmatprep.subr.mxu0 %v2396_v16 }
 0x337   :  { %2454 = vmatpush2.msra.mxu0 %v2395_v2 }
 0x338   :  { %2455 = vmatprep.subr.mxu0 %v2394_v41 }
 0x339   :  { %2456 = vmatpush2.msra.mxu0 %v2393_v15 }
 0x33a   :  { %2457 = vmatprep.subr.mxu0 %v2392_v38 }
 0x33b   :  { %2458 = vmatpush2.msra.mxu0 %v2391_v54 }
 0x33c   :  { %2459 = vmatprep.subr.mxu0 %v2390_v34 }
 0x33d   :  { %2460 = vmatpush2.msra.mxu0 %v2389_v1 }
 0x33e   :  { %2461 = vmatprep.subr.mxu0 %v2388_v24 }
 0x33f   :  { %2462 = vmatpush2.msra.mxu0 %v2387_v36 }
 0x340   :  { %2463 = vmatprep.subr.mxu0 %v2386_v5 }
 0x341   :  { %2464 = vmatpush2.msra.mxu0 %v2385_v32 }
 0x342   :  { %2465 = vmatprep.subr.mxu0 %v2384_v19 }
 0x343   :  { %2466 = vmatpush2.msra.mxu0 %v2383_v22 }
 0x344   :  { %2467 = vmatprep.subr.mxu0 %v2382_v18 }
 0x345   :  { %2468 = vmatpush2.msra.mxu0 %v2381_v13 }
 0x346   :  { %2469 = vmatprep.subr.mxu0 %v2380_v51 }
 0x347   :  { %2470 = vmatpush2.msra.mxu0 %v2379_v43 }
 0x348   :  { %2471 = vmatprep.subr.mxu0 %v2378_v39 }
 0x349   :  { %2472 = vmatpush2.msra.mxu0 %v2377_v25 }
 0x34a   :  { %2473 = vmatprep.subr.mxu0 %v2376_v37 }
 0x34b   :  { %2474 = vmatpush2.msra.mxu0 %v2375_v59 }
 0x34c   :  { %2476 = vmatmul.mubr.f32.vlgmr.msra.gmra.mxu0 %v2409_v26 }
 0x38c   :  { %v2548_v47 = vpop.f32.mrf.mxu1 }
 0x38e   :  { %v2550_v60 = vpop.f32.mrf.mxu1 }
 0x40c   :  { %v2477_v0 = vpop.f32.mrf.mxu0 }
 0x40d   :  { %v2549_v17 = vadd.f32 %v2548_v47, %v2477_v0 }
 0x40e   :  { %v2479_v4 = vpop.f32.mrf.mxu0 }
 0x40f   :  { %v2559_v61 = vadd.f32 %v2557_v63, %v2549_v17  ;;  %v2551_v49 = vadd.f32 %v2550_v60, %v2479_v4 }
 0x411   :  { %2561 = vst [vmem:[#allocation2] sm:$0xff] %v2559_v61  ;;  %v2560_v62 = vadd.f32 %v2557_v63, %v2551_v49 }
 0x413   :  { %2562 = vst [vmem:[#allocation2 + $0x8] sm:$0xff] %v2560_v62 }
 0x414   :  { %2721 = shalt.err (!%p2718_p4)
}
 0x415   :  { %2572 = dma.vmem_to_hbm [thread:$0]  %s2570_s16, 256, %s4693_s8, [#allocation3]  }
 0x416   :  { %2730 = dma.done.wait [#allocation3], 256  }
 0x417   :  { %2731 = vsyncadd [#allocation3], 4294967040 }
 0x418   :  { %2576 = vsyncpa [#allocation3], 1 }

</bundles_post_ra>
